<compile_context>
chip_gen: v5e
topology: v5e:2x2
jax: 0.10.0
libtpu: 0.0.40
codegen_flags: <defaults>
</compile_context>

<pallas_src>
import functools

import jax
import jax.numpy as jnp
from jax.experimental import pallas as pl
from jax.experimental.pallas import tpu as pltpu


# ----------------------------- kernel helpers -----------------------------

def _layer_norm(y, g, b, eps=1e-5):
    mu = jnp.mean(y, axis=-1, keepdims=True)
    var = jnp.mean((y - mu) ** 2, axis=-1, keepdims=True)
    return (y - mu) * jax.lax.rsqrt(var + eps) * g + b


def _mha_block(x_q, x_k, v_src, residual,
               wq, bq, wk, bk, wv, bv, wo, bo, g, be, nhead, mask=None):
    """Post-norm residual MHA: LayerNorm(residual + MHA(x_q, x_k, v_src))."""
    e = x_q.shape[-1]
    dh = e // nhead
    scale = 1.0 / (dh ** 0.5)

    # fused QKV projection; attention scale folded into q once
    q = (jnp.dot(x_q, wq, preferred_element_type=jnp.float32) + bq) * scale
    k = jnp.dot(x_k, wk, preferred_element_type=jnp.float32) + bk
    v = jnp.dot(v_src, wv, preferred_element_type=jnp.float32) + bv

    # out-proj bias + residual accumulated directly into the result slab
    y = residual + bo
    dn = (((1,), (1,)), ((), ()))           # q . k^T without explicit transpose
    for h in range(nhead):                  # static unroll over heads
        sl = slice(h * dh, (h + 1) * dh)
        s = jax.lax.dot_general(q[:, sl], k[:, sl], dn,
                                preferred_element_type=jnp.float32)
        if mask is not None:
            s = s + mask                    # (1, Lk) broadcast inside kernel
        s = s - jnp.max(s, axis=-1, keepdims=True)
        p = jnp.exp(s)
        p = p * pl.reciprocal(jnp.sum(p, axis=-1, keepdims=True), approx=True)
        ctx = jnp.dot(p, v[:, sl], preferred_element_type=jnp.float32)
        # per-head slice of the output projection: sum_h ctx_h @ Wo[h]
        y = y + jnp.dot(ctx, wo[sl, :], preferred_element_type=jnp.float32)

    return _layer_norm(y, g, be)


# ----------------------------- Pallas kernels -----------------------------

def _dual_attn_kernel(tok_ref, qpos_ref, mem_ref, kpos_ref,
                      swq, sbq, swk, sbk, swv, sbv, swo, sbo, sg, sb,
                      cwq, cbq, cwk, cbk, cwv, cbv, cwo, cbo, cg, cb,
                      *rest, nhead, has_mask):
    """Fused (self-attn + LN) -> (cross-attn + LN) for one batch element."""
    if has_mask:
        mask_ref, o_ref = rest
        mask = mask_ref[0]                  # (1, Lk)
    else:
        (o_ref,) = rest
        mask = None

    tok = tok_ref[0]                        # (Lq, E)
    qpos = qpos_ref[0]                      # (Lq, E)
    mem = mem_ref[0]                        # (Lk, E)
    kpos = kpos_ref[0]                      # (Lk, E)

    # self-attention: q = k = tok + qpos, v = residual = tok, no mask
    xq = tok + qpos
    t1 = _mha_block(xq, xq, tok, tok,
                    swq[...], sbq[...], swk[...], sbk[...], swv[...], sbv[...],
                    swo[...], sbo[...], sg[...], sb[...], nhead)

    # cross-attention: q = t1 + qpos, k = mem + kpos, v = mem, residual = t1
    out = _mha_block(t1 + qpos, mem + kpos, mem, t1,
                     cwq[...], cbq[...], cwk[...], cbk[...], cwv[...], cbv[...],
                     cwo[...], cbo[...], cg[...], cb[...], nhead, mask=mask)

    o_ref[0] = out.astype(o_ref.dtype)


def _mlp_ln_kernel(x_ref, w1_ref, b1_ref, w2_ref, b2_ref,
                   g_ref, be_ref, fg_ref, fb_ref, o_ref, f_ref):
    """tokens = LN_ffn(x + W2 relu(W1 x + b1) + b2);  feature = LN_final(tokens)."""
    x = x_ref[...]
    h = jnp.dot(x, w1_ref[...], preferred_element_type=jnp.float32) + b1_ref[...]
    h = jnp.maximum(h, 0.0)
    y = jnp.dot(h, w2_ref[...], preferred_element_type=jnp.float32) + b2_ref[...] + x
    t = _layer_norm(y, g_ref[...], be_ref[...])
    o_ref[...] = t.astype(o_ref.dtype)
    f_ref[...] = _layer_norm(t, fg_ref[...], fb_ref[...]).astype(f_ref.dtype)


# ----------------------------- wrappers -----------------------------

def _row_tile(m, cap=512):
    """Largest multiple-of-8 tile <= min(M//2, cap) that divides M (>=2 grid
    steps so the second TensorCore gets work); fall back to full M."""
    best = None
    t = 8
    hi = min(m // 2, cap)
    while t <= hi:
        if m % t == 0:
            best = t
        t += 8
    return best if best is not None else m


def dual_attention(tokens, cross_pos, cross_tokens, pos,
                   sa, sg, sb, ca, cg, cb, nhead, mask_bias=None):
    """Fused self+cross residual attention: one pallas_call, grid over batch."""
    B, Lq, E = tokens.shape
    Lk = cross_tokens.shape[1]
    has_mask = mask_bias is not None

    kern = functools.partial(_dual_attn_kernel, nhead=nhead, has_mask=has_mask)

    tok_spec = pl.BlockSpec((1, Lq, E), lambda i: (i, 0, 0))
    mem_spec = pl.BlockSpec((1, Lk, E), lambda i: (i, 0, 0))
    w_spec = pl.BlockSpec((E, E), lambda i: (0, 0))
    b_spec = pl.BlockSpec((1, E), lambda i: (0, 0))

    def mha_specs():
        return [w_spec, b_spec, w_spec, b_spec, w_spec, b_spec, w_spec, b_spec,
                b_spec, b_spec]

    def mha_args(ap, g, b):
        return [ap["w_q"], ap["b_q"].reshape(1, E),
                ap["w_k"], ap["b_k"].reshape(1, E),
                ap["w_v"], ap["b_v"].reshape(1, E),
                ap["w_o"], ap["b_o"].reshape(1, E),
                g.reshape(1, E), b.reshape(1, E)]

    in_specs = [tok_spec, tok_spec, mem_spec, mem_spec] + mha_specs() + mha_specs()
    args = ([tokens, cross_pos, cross_tokens, pos]
            + mha_args(sa, sg, sb) + mha_args(ca, cg, cb))
    if has_mask:
        in_specs.append(pl.BlockSpec((1, 1, Lk), lambda i: (i, 0, 0)))
        args.append(mask_bias)

    return pl.pallas_call(
        kern,
        out_shape=jax.ShapeDtypeStruct((B, Lq, E), tokens.dtype),
        grid=(B,),
        in_specs=in_specs,
        out_specs=pl.BlockSpec((1, Lq, E), lambda i: (i, 0, 0)),
        compiler_params=pltpu.CompilerParams(
            dimension_semantics=("parallel",),
            vmem_limit_bytes=32 * 1024 * 1024),
    )(*args)


def mlp_residual_ln(x, w1, b1, w2, b2, g, b, fg, fb):
    """Returns (next-layer tokens, per-layer feature) in one pallas_call."""
    B, L, E = x.shape
    M = B * L
    F = w1.shape[1]
    tm = _row_tile(M)

    tile_spec = pl.BlockSpec((tm, E), lambda i: (i, 0))
    tok_out, feat_out = pl.pallas_call(
        _mlp_ln_kernel,
        out_shape=(jax.ShapeDtypeStruct((M, E), x.dtype),
                   jax.ShapeDtypeStruct((M, E), x.dtype)),
        grid=(M // tm,),
        in_specs=[tile_spec,
                  pl.BlockSpec((E, F), lambda i: (0, 0)),
                  pl.BlockSpec((1, F), lambda i: (0, 0)),
                  pl.BlockSpec((F, E), lambda i: (0, 0)),
                  pl.BlockSpec((1, E), lambda i: (0, 0)),
                  pl.BlockSpec((1, E), lambda i: (0, 0)),
                  pl.BlockSpec((1, E), lambda i: (0, 0)),
                  pl.BlockSpec((1, E), lambda i: (0, 0)),
                  pl.BlockSpec((1, E), lambda i: (0, 0))],
        out_specs=(tile_spec, tile_spec),
        compiler_params=pltpu.CompilerParams(
            dimension_semantics=("parallel",),
            vmem_limit_bytes=32 * 1024 * 1024),
    )(x.reshape(M, E), w1, b1.reshape(1, F), w2, b2.reshape(1, E),
      g.reshape(1, E), b.reshape(1, E), fg.reshape(1, E), fb.reshape(1, E))
    return tok_out.reshape(B, L, E), feat_out.reshape(B, L, E)


# ----------------------------- model -----------------------------

def transformer_decoder(tokens, cross_tokens, pos, cross_pos, params, nhead,
                        key_mask=None):
    if key_mask is not None:
        # (B, Lk) bool, True == ignore -> additive bias (B, 1, Lk).
        # Large finite negative (not -inf) so fully-masked rows stay NaN-free.
        B, Lk = key_mask.shape
        mask_bias = jnp.where(key_mask, -1e30, 0.0).astype(tokens.dtype)
        mask_bias = mask_bias.reshape(B, 1, Lk)
    else:
        mask_bias = None

    # TODO(synk): dropout (p=0.1) is identity here (eval-mode forward pass).
    features = []
    for lp in params["layers"]:
        tokens = dual_attention(tokens, cross_pos, cross_tokens, pos,
                                lp["self_attn"], lp["sa_norm_g"], lp["sa_norm_b"],
                                lp["cross_attn"], lp["ca_norm_g"], lp["ca_norm_b"],
                                nhead, mask_bias=mask_bias)
        tokens, feat = mlp_residual_ln(tokens, lp["w1"], lp["b1"],
                                       lp["w2"], lp["b2"],
                                       lp["ffn_norm_g"], lp["ffn_norm_b"],
                                       params["norm_g"], params["norm_b"])
        features.append(feat)
    return features


# ----------------------------- parameter init -----------------------------

def init_params(key, d_model, num_layers, d_ff):
    counter = [0]

    def w(shape, scale=0.05):
        counter[0] += 1
        k = jax.random.fold_in(key, counter[0])
        return (scale * jax.random.normal(k, shape)).astype(jnp.float32)

    def mha_params():
        return dict(
            w_q=w((d_model, d_model)), b_q=w((d_model,)),
            w_k=w((d_model, d_model)), b_k=w((d_model,)),
            w_v=w((d_model, d_model)), b_v=w((d_model,)),
            w_o=w((d_model, d_model)), b_o=w((d_model,)),
        )

    layers = []
    for _ in range(num_layers):
        layers.append(dict(
            self_attn=mha_params(),
            cross_attn=mha_params(),
            sa_norm_g=jnp.ones((d_model,), jnp.float32),
            sa_norm_b=jnp.zeros((d_model,), jnp.float32),
            ca_norm_g=jnp.ones((d_model,), jnp.float32),
            ca_norm_b=jnp.zeros((d_model,), jnp.float32),
            w1=w((d_model, d_ff)), b1=w((d_ff,)),
            w2=w((d_ff, d_model)), b2=w((d_model,)),
            ffn_norm_g=jnp.ones((d_model,), jnp.float32),
            ffn_norm_b=jnp.zeros((d_model,), jnp.float32),
        ))
    return dict(
        layers=layers,
        norm_g=jnp.ones((d_model,), jnp.float32),
        norm_b=jnp.zeros((d_model,), jnp.float32),
    )


# ----------------------------- main -----------------------------

if __name__ == "__main__":
    B, Lq, Lk = 2, 8, 16              # batch, num query tokens, memory length
    d_model, nhead, num_layers = 32, 4, 2
    d_ff = 8 * d_model                # TransformerLayer default dim_feedforward

    key = jax.random.PRNGKey(0)
    k1, k2, k3, k4, kp = jax.random.split(key, 5)
    tokens = jax.random.normal(k1, (B, Lq, d_model), jnp.float32)       # queries
    cross_tokens = jax.random.normal(k2, (B, Lk, d_model), jnp.float32) # memory
    pos = jax.random.normal(k3, (B, Lk, d_model), jnp.float32)          # memory pos emb
    cross_pos = jax.random.normal(k4, (B, Lq, d_model), jnp.float32)    # query pos emb

    params = init_params(kp, d_model, num_layers, d_ff)

    # unmasked path (module default)
    features = transformer_decoder(tokens, cross_tokens, pos, cross_pos,
                                   params, nhead, key_mask=None)
    features = jax.block_until_ready(features)
    assert len(features) == num_layers
    assert all(f.shape == (B, Lq, d_model) for f in features)
    assert all(bool(jnp.all(jnp.isfinite(f))) for f in features)

    # key-padding-mask path (True == ignore): mask last 4 memory slots of batch 1
    key_mask = jnp.zeros((B, Lk), jnp.bool_).at[1, Lk - 4:].set(True)
    features_m = transformer_decoder(tokens, cross_tokens, pos, cross_pos,
                                     params, nhead, key_mask=key_mask)
    features_m = jax.block_until_ready(features_m)
    assert all(f.shape == (B, Lq, d_model) for f in features_m)
    assert all(bool(jnp.all(jnp.isfinite(f))) for f in features_m)

    print("KERNEL_OK")
</pallas_src>

<mosaic_0001>
module attributes {stable_mosaic.version = 11 : i64} {
  func.func @_dual_attn_kernel(%arg0: i32, %arg1: memref<1x8x32xf32, #tpu.memory_space<vmem>>, %arg2: memref<1x8x32xf32, #tpu.memory_space<vmem>>, %arg3: memref<1x16x32xf32, #tpu.memory_space<vmem>>, %arg4: memref<1x16x32xf32, #tpu.memory_space<vmem>>, %arg5: memref<32x32xf32, #tpu.memory_space<vmem>>, %arg6: memref<1x32xf32, #tpu.memory_space<vmem>>, %arg7: memref<32x32xf32, #tpu.memory_space<vmem>>, %arg8: memref<1x32xf32, #tpu.memory_space<vmem>>, %arg9: memref<32x32xf32, #tpu.memory_space<vmem>>, %arg10: memref<1x32xf32, #tpu.memory_space<vmem>>, %arg11: memref<32x32xf32, #tpu.memory_space<vmem>>, %arg12: memref<1x32xf32, #tpu.memory_space<vmem>>, %arg13: memref<1x32xf32, #tpu.memory_space<vmem>>, %arg14: memref<1x32xf32, #tpu.memory_space<vmem>>, %arg15: memref<32x32xf32, #tpu.memory_space<vmem>>, %arg16: memref<1x32xf32, #tpu.memory_space<vmem>>, %arg17: memref<32x32xf32, #tpu.memory_space<vmem>>, %arg18: memref<1x32xf32, #tpu.memory_space<vmem>>, %arg19: memref<32x32xf32, #tpu.memory_space<vmem>>, %arg20: memref<1x32xf32, #tpu.memory_space<vmem>>, %arg21: memref<32x32xf32, #tpu.memory_space<vmem>>, %arg22: memref<1x32xf32, #tpu.memory_space<vmem>>, %arg23: memref<1x32xf32, #tpu.memory_space<vmem>>, %arg24: memref<1x32xf32, #tpu.memory_space<vmem>>, %arg25: memref<1x8x32xf32, #tpu.memory_space<vmem>>) attributes {dimension_semantics = [#tpu.dimension_semantics<parallel>], iteration_bounds = array<i64: 2>, scalar_prefetch = 0 : i64, scratch_operands = 0 : i64, tpu.core_type = #tpu.core_type<tc>, window_params = [{transform_indices = @transform_0, window_bounds = array<i64: 1, 8, 32>}, {transform_indices = @transform_1, window_bounds = array<i64: 1, 8, 32>}, {transform_indices = @transform_2, window_bounds = array<i64: 1, 16, 32>}, {transform_indices = @transform_3, window_bounds = array<i64: 1, 16, 32>}, {pipeline_mode = #tpu.pipeline_mode<synchronous>, transform_indices = @transform_4, window_bounds = array<i64: 32, 32>}, {pipeline_mode = #tpu.pipeline_mode<synchronous>, transform_indices = @transform_5, window_bounds = array<i64: 1, 32>}, {pipeline_mode = #tpu.pipeline_mode<synchronous>, transform_indices = @transform_6, window_bounds = array<i64: 32, 32>}, {pipeline_mode = #tpu.pipeline_mode<synchronous>, transform_indices = @transform_7, window_bounds = array<i64: 1, 32>}, {pipeline_mode = #tpu.pipeline_mode<synchronous>, transform_indices = @transform_8, window_bounds = array<i64: 32, 32>}, {pipeline_mode = #tpu.pipeline_mode<synchronous>, transform_indices = @transform_9, window_bounds = array<i64: 1, 32>}, {pipeline_mode = #tpu.pipeline_mode<synchronous>, transform_indices = @transform_10, window_bounds = array<i64: 32, 32>}, {pipeline_mode = #tpu.pipeline_mode<synchronous>, transform_indices = @transform_11, window_bounds = array<i64: 1, 32>}, {pipeline_mode = #tpu.pipeline_mode<synchronous>, transform_indices = @transform_12, window_bounds = array<i64: 1, 32>}, {pipeline_mode = #tpu.pipeline_mode<synchronous>, transform_indices = @transform_13, window_bounds = array<i64: 1, 32>}, {pipeline_mode = #tpu.pipeline_mode<synchronous>, transform_indices = @transform_14, window_bounds = array<i64: 32, 32>}, {pipeline_mode = #tpu.pipeline_mode<synchronous>, transform_indices = @transform_15, window_bounds = array<i64: 1, 32>}, {pipeline_mode = #tpu.pipeline_mode<synchronous>, transform_indices = @transform_16, window_bounds = array<i64: 32, 32>}, {pipeline_mode = #tpu.pipeline_mode<synchronous>, transform_indices = @transform_17, window_bounds = array<i64: 1, 32>}, {pipeline_mode = #tpu.pipeline_mode<synchronous>, transform_indices = @transform_18, window_bounds = array<i64: 32, 32>}, {pipeline_mode = #tpu.pipeline_mode<synchronous>, transform_indices = @transform_19, window_bounds = array<i64: 1, 32>}, {pipeline_mode = #tpu.pipeline_mode<synchronous>, transform_indices = @transform_20, window_bounds = array<i64: 32, 32>}, {pipeline_mode = #tpu.pipeline_mode<synchronous>, transform_indices = @transform_21, window_bounds = array<i64: 1, 32>}, {pipeline_mode = #tpu.pipeline_mode<synchronous>, transform_indices = @transform_22, window_bounds = array<i64: 1, 32>}, {pipeline_mode = #tpu.pipeline_mode<synchronous>, transform_indices = @transform_23, window_bounds = array<i64: 1, 32>}, {transform_indices = @transform_24, window_bounds = array<i64: 1, 8, 32>}]} {
    %c0 = arith.constant 0 : index
    %c0_0 = arith.constant 0 : index
    %c0_1 = arith.constant 0 : index
    %0 = vector.load %arg1[%c0, %c0_0, %c0_1] : memref<1x8x32xf32, #tpu.memory_space<vmem>>, vector<1x8x32xf32>
    %1 = vector.shape_cast %0 : vector<1x8x32xf32> to vector<8x32xf32>
    %c0_2 = arith.constant 0 : index
    %c0_3 = arith.constant 0 : index
    %c0_4 = arith.constant 0 : index
    %2 = vector.load %arg2[%c0_2, %c0_3, %c0_4] : memref<1x8x32xf32, #tpu.memory_space<vmem>>, vector<1x8x32xf32>
    %3 = vector.shape_cast %2 : vector<1x8x32xf32> to vector<8x32xf32>
    %c0_5 = arith.constant 0 : index
    %c0_6 = arith.constant 0 : index
    %c0_7 = arith.constant 0 : index
    %4 = vector.load %arg3[%c0_5, %c0_6, %c0_7] : memref<1x16x32xf32, #tpu.memory_space<vmem>>, vector<1x16x32xf32>
    %5 = vector.shape_cast %4 : vector<1x16x32xf32> to vector<16x32xf32>
    %c0_8 = arith.constant 0 : index
    %c0_9 = arith.constant 0 : index
    %c0_10 = arith.constant 0 : index
    %6 = vector.load %arg4[%c0_8, %c0_9, %c0_10] : memref<1x16x32xf32, #tpu.memory_space<vmem>>, vector<1x16x32xf32>
    %7 = vector.shape_cast %6 : vector<1x16x32xf32> to vector<16x32xf32>
    %8 = arith.addf %1, %3 : vector<8x32xf32>
    %c0_11 = arith.constant 0 : index
    %c0_12 = arith.constant 0 : index
    %9 = vector.load %arg5[%c0_11, %c0_12] : memref<32x32xf32, #tpu.memory_space<vmem>>, vector<32x32xf32>
    %c0_13 = arith.constant 0 : index
    %c0_14 = arith.constant 0 : index
    %10 = vector.load %arg6[%c0_13, %c0_14] : memref<1x32xf32, #tpu.memory_space<vmem>>, vector<1x32xf32>
    %c0_15 = arith.constant 0 : index
    %c0_16 = arith.constant 0 : index
    %11 = vector.load %arg7[%c0_15, %c0_16] : memref<32x32xf32, #tpu.memory_space<vmem>>, vector<32x32xf32>
    %c0_17 = arith.constant 0 : index
    %c0_18 = arith.constant 0 : index
    %12 = vector.load %arg8[%c0_17, %c0_18] : memref<1x32xf32, #tpu.memory_space<vmem>>, vector<1x32xf32>
    %c0_19 = arith.constant 0 : index
    %c0_20 = arith.constant 0 : index
    %13 = vector.load %arg9[%c0_19, %c0_20] : memref<32x32xf32, #tpu.memory_space<vmem>>, vector<32x32xf32>
    %c0_21 = arith.constant 0 : index
    %c0_22 = arith.constant 0 : index
    %14 = vector.load %arg10[%c0_21, %c0_22] : memref<1x32xf32, #tpu.memory_space<vmem>>, vector<1x32xf32>
    %c0_23 = arith.constant 0 : index
    %c0_24 = arith.constant 0 : index
    %15 = vector.load %arg11[%c0_23, %c0_24] : memref<32x32xf32, #tpu.memory_space<vmem>>, vector<32x32xf32>
    %c0_25 = arith.constant 0 : index
    %c0_26 = arith.constant 0 : index
    %16 = vector.load %arg12[%c0_25, %c0_26] : memref<1x32xf32, #tpu.memory_space<vmem>>, vector<1x32xf32>
    %c0_27 = arith.constant 0 : index
    %c0_28 = arith.constant 0 : index
    %17 = vector.load %arg13[%c0_27, %c0_28] : memref<1x32xf32, #tpu.memory_space<vmem>>, vector<1x32xf32>
    %c0_29 = arith.constant 0 : index
    %c0_30 = arith.constant 0 : index
    %18 = vector.load %arg14[%c0_29, %c0_30] : memref<1x32xf32, #tpu.memory_space<vmem>>, vector<1x32xf32>
    %cst = arith.constant dense<0.000000e+00> : vector<8x32xf32>
    %19 = tpu.matmul %8, %9, %cst {dimension_numbers = #tpu.dot_dimension_numbers<[1], [0], [0], [1], [0, 0, 1, 1], [], []>} : vector<8x32xf32>, vector<32x32xf32>, vector<8x32xf32> -> vector<8x32xf32>
    %20 = vector.broadcast %10 : vector<1x32xf32> to vector<8x32xf32>
    %21 = arith.addf %19, %20 : vector<8x32xf32>
    %cst_31 = arith.constant 0.353553385 : f32
    %22 = vector.broadcast %cst_31 : f32 to vector<8x32xf32>
    %23 = arith.mulf %21, %22 : vector<8x32xf32>
    %cst_32 = arith.constant dense<0.000000e+00> : vector<8x32xf32>
    %24 = tpu.matmul %8, %11, %cst_32 {dimension_numbers = #tpu.dot_dimension_numbers<[1], [0], [0], [1], [0, 0, 1, 1], [], []>} : vector<8x32xf32>, vector<32x32xf32>, vector<8x32xf32> -> vector<8x32xf32>
    %25 = vector.broadcast %12 : vector<1x32xf32> to vector<8x32xf32>
    %26 = arith.addf %24, %25 : vector<8x32xf32>
    %cst_33 = arith.constant dense<0.000000e+00> : vector<8x32xf32>
    %27 = tpu.matmul %1, %13, %cst_33 {dimension_numbers = #tpu.dot_dimension_numbers<[1], [0], [0], [1], [0, 0, 1, 1], [], []>} : vector<8x32xf32>, vector<32x32xf32>, vector<8x32xf32> -> vector<8x32xf32>
    %28 = vector.broadcast %14 : vector<1x32xf32> to vector<8x32xf32>
    %29 = arith.addf %27, %28 : vector<8x32xf32>
    %30 = vector.broadcast %16 : vector<1x32xf32> to vector<8x32xf32>
    %31 = arith.addf %1, %30 : vector<8x32xf32>
    %32 = vector.extract_strided_slice %23 {offsets = [0, 0], sizes = [8, 8], strides = [1, 1]} : vector<8x32xf32> to vector<8x8xf32>
    %33 = vector.extract_strided_slice %26 {offsets = [0, 0], sizes = [8, 8], strides = [1, 1]} : vector<8x32xf32> to vector<8x8xf32>
    %cst_34 = arith.constant dense<0.000000e+00> : vector<8x8xf32>
    %34 = tpu.matmul %32, %33, %cst_34 {dimension_numbers = #tpu.dot_dimension_numbers<[1], [1], [0], [0], [0, 0, 1, 0], [], []>} : vector<8x8xf32>, vector<8x8xf32>, vector<8x8xf32> -> vector<8x8xf32>
    %cst_35 = arith.constant dense<0xFF800000> : vector<8xf32>
    %35 = vector.multi_reduction <maximumf>, %34, %cst_35 [1] : vector<8x8xf32> to vector<8xf32>
    %36 = vector.shape_cast %35 : vector<8xf32> to vector<8x1xf32>
    %37 = vector.broadcast %36 : vector<8x1xf32> to vector<8x8xf32>
    %38 = arith.subf %34, %37 : vector<8x8xf32>
    %39 = math.exp %38 : vector<8x8xf32>
    %cst_36 = arith.constant dense<0.000000e+00> : vector<8xf32>
    %40 = vector.multi_reduction <add>, %39, %cst_36 [1] : vector<8x8xf32> to vector<8xf32>
    %41 = vector.shape_cast %40 : vector<8xf32> to vector<8x1xf32>
    %42 = tpu.reciprocal %41 {approx = true} : vector<8x1xf32> -> vector<8x1xf32>
    %43 = vector.broadcast %42 : vector<8x1xf32> to vector<8x8xf32>
    %44 = arith.mulf %39, %43 : vector<8x8xf32>
    %45 = vector.extract_strided_slice %29 {offsets = [0, 0], sizes = [8, 8], strides = [1, 1]} : vector<8x32xf32> to vector<8x8xf32>
    %cst_37 = arith.constant dense<0.000000e+00> : vector<8x8xf32>
    %46 = tpu.matmul %44, %45, %cst_37 {dimension_numbers = #tpu.dot_dimension_numbers<[1], [0], [0], [1], [0, 0, 1, 1], [], []>} : vector<8x8xf32>, vector<8x8xf32>, vector<8x8xf32> -> vector<8x8xf32>
    %47 = vector.extract_strided_slice %15 {offsets = [0, 0], sizes = [8, 32], strides = [1, 1]} : vector<32x32xf32> to vector<8x32xf32>
    %cst_38 = arith.constant dense<0.000000e+00> : vector<8x32xf32>
    %48 = tpu.matmul %46, %47, %cst_38 {dimension_numbers = #tpu.dot_dimension_numbers<[1], [0], [0], [1], [0, 0, 1, 1], [], []>} : vector<8x8xf32>, vector<8x32xf32>, vector<8x32xf32> -> vector<8x32xf32>
    %49 = arith.addf %31, %48 : vector<8x32xf32>
    %50 = vector.extract_strided_slice %23 {offsets = [0, 8], sizes = [8, 8], strides = [1, 1]} : vector<8x32xf32> to vector<8x8xf32>
    %51 = vector.extract_strided_slice %26 {offsets = [0, 8], sizes = [8, 8], strides = [1, 1]} : vector<8x32xf32> to vector<8x8xf32>
    %cst_39 = arith.constant dense<0.000000e+00> : vector<8x8xf32>
    %52 = tpu.matmul %50, %51, %cst_39 {dimension_numbers = #tpu.dot_dimension_numbers<[1], [1], [0], [0], [0, 0, 1, 0], [], []>} : vector<8x8xf32>, vector<8x8xf32>, vector<8x8xf32> -> vector<8x8xf32>
    %cst_40 = arith.constant dense<0xFF800000> : vector<8xf32>
    %53 = vector.multi_reduction <maximumf>, %52, %cst_40 [1] : vector<8x8xf32> to vector<8xf32>
    %54 = vector.shape_cast %53 : vector<8xf32> to vector<8x1xf32>
    %55 = vector.broadcast %54 : vector<8x1xf32> to vector<8x8xf32>
    %56 = arith.subf %52, %55 : vector<8x8xf32>
    %57 = math.exp %56 : vector<8x8xf32>
    %cst_41 = arith.constant dense<0.000000e+00> : vector<8xf32>
    %58 = vector.multi_reduction <add>, %57, %cst_41 [1] : vector<8x8xf32> to vector<8xf32>
    %59 = vector.shape_cast %58 : vector<8xf32> to vector<8x1xf32>
    %60 = tpu.reciprocal %59 {approx = true} : vector<8x1xf32> -> vector<8x1xf32>
    %61 = vector.broadcast %60 : vector<8x1xf32> to vector<8x8xf32>
    %62 = arith.mulf %57, %61 : vector<8x8xf32>
    %63 = vector.extract_strided_slice %29 {offsets = [0, 8], sizes = [8, 8], strides = [1, 1]} : vector<8x32xf32> to vector<8x8xf32>
    %cst_42 = arith.constant dense<0.000000e+00> : vector<8x8xf32>
    %64 = tpu.matmul %62, %63, %cst_42 {dimension_numbers = #tpu.dot_dimension_numbers<[1], [0], [0], [1], [0, 0, 1, 1], [], []>} : vector<8x8xf32>, vector<8x8xf32>, vector<8x8xf32> -> vector<8x8xf32>
    %65 = vector.extract_strided_slice %15 {offsets = [8, 0], sizes = [8, 32], strides = [1, 1]} : vector<32x32xf32> to vector<8x32xf32>
    %cst_43 = arith.constant dense<0.000000e+00> : vector<8x32xf32>
    %66 = tpu.matmul %64, %65, %cst_43 {dimension_numbers = #tpu.dot_dimension_numbers<[1], [0], [0], [1], [0, 0, 1, 1], [], []>} : vector<8x8xf32>, vector<8x32xf32>, vector<8x32xf32> -> vector<8x32xf32>
    %67 = arith.addf %49, %66 : vector<8x32xf32>
    %68 = vector.extract_strided_slice %23 {offsets = [0, 16], sizes = [8, 8], strides = [1, 1]} : vector<8x32xf32> to vector<8x8xf32>
    %69 = vector.extract_strided_slice %26 {offsets = [0, 16], sizes = [8, 8], strides = [1, 1]} : vector<8x32xf32> to vector<8x8xf32>
    %cst_44 = arith.constant dense<0.000000e+00> : vector<8x8xf32>
    %70 = tpu.matmul %68, %69, %cst_44 {dimension_numbers = #tpu.dot_dimension_numbers<[1], [1], [0], [0], [0, 0, 1, 0], [], []>} : vector<8x8xf32>, vector<8x8xf32>, vector<8x8xf32> -> vector<8x8xf32>
    %cst_45 = arith.constant dense<0xFF800000> : vector<8xf32>
    %71 = vector.multi_reduction <maximumf>, %70, %cst_45 [1] : vector<8x8xf32> to vector<8xf32>
    %72 = vector.shape_cast %71 : vector<8xf32> to vector<8x1xf32>
    %73 = vector.broadcast %72 : vector<8x1xf32> to vector<8x8xf32>
    %74 = arith.subf %70, %73 : vector<8x8xf32>
    %75 = math.exp %74 : vector<8x8xf32>
    %cst_46 = arith.constant dense<0.000000e+00> : vector<8xf32>
    %76 = vector.multi_reduction <add>, %75, %cst_46 [1] : vector<8x8xf32> to vector<8xf32>
    %77 = vector.shape_cast %76 : vector<8xf32> to vector<8x1xf32>
    %78 = tpu.reciprocal %77 {approx = true} : vector<8x1xf32> -> vector<8x1xf32>
    %79 = vector.broadcast %78 : vector<8x1xf32> to vector<8x8xf32>
    %80 = arith.mulf %75, %79 : vector<8x8xf32>
    %81 = vector.extract_strided_slice %29 {offsets = [0, 16], sizes = [8, 8], strides = [1, 1]} : vector<8x32xf32> to vector<8x8xf32>
    %cst_47 = arith.constant dense<0.000000e+00> : vector<8x8xf32>
    %82 = tpu.matmul %80, %81, %cst_47 {dimension_numbers = #tpu.dot_dimension_numbers<[1], [0], [0], [1], [0, 0, 1, 1], [], []>} : vector<8x8xf32>, vector<8x8xf32>, vector<8x8xf32> -> vector<8x8xf32>
    %83 = vector.extract_strided_slice %15 {offsets = [16, 0], sizes = [8, 32], strides = [1, 1]} : vector<32x32xf32> to vector<8x32xf32>
    %cst_48 = arith.constant dense<0.000000e+00> : vector<8x32xf32>
    %84 = tpu.matmul %82, %83, %cst_48 {dimension_numbers = #tpu.dot_dimension_numbers<[1], [0], [0], [1], [0, 0, 1, 1], [], []>} : vector<8x8xf32>, vector<8x32xf32>, vector<8x32xf32> -> vector<8x32xf32>
    %85 = arith.addf %67, %84 : vector<8x32xf32>
    %86 = vector.extract_strided_slice %23 {offsets = [0, 24], sizes = [8, 8], strides = [1, 1]} : vector<8x32xf32> to vector<8x8xf32>
    %87 = vector.extract_strided_slice %26 {offsets = [0, 24], sizes = [8, 8], strides = [1, 1]} : vector<8x32xf32> to vector<8x8xf32>
    %cst_49 = arith.constant dense<0.000000e+00> : vector<8x8xf32>
    %88 = tpu.matmul %86, %87, %cst_49 {dimension_numbers = #tpu.dot_dimension_numbers<[1], [1], [0], [0], [0, 0, 1, 0], [], []>} : vector<8x8xf32>, vector<8x8xf32>, vector<8x8xf32> -> vector<8x8xf32>
    %cst_50 = arith.constant dense<0xFF800000> : vector<8xf32>
    %89 = vector.multi_reduction <maximumf>, %88, %cst_50 [1] : vector<8x8xf32> to vector<8xf32>
    %90 = vector.shape_cast %89 : vector<8xf32> to vector<8x1xf32>
    %91 = vector.broadcast %90 : vector<8x1xf32> to vector<8x8xf32>
    %92 = arith.subf %88, %91 : vector<8x8xf32>
    %93 = math.exp %92 : vector<8x8xf32>
    %cst_51 = arith.constant dense<0.000000e+00> : vector<8xf32>
    %94 = vector.multi_reduction <add>, %93, %cst_51 [1] : vector<8x8xf32> to vector<8xf32>
    %95 = vector.shape_cast %94 : vector<8xf32> to vector<8x1xf32>
    %96 = tpu.reciprocal %95 {approx = true} : vector<8x1xf32> -> vector<8x1xf32>
    %97 = vector.broadcast %96 : vector<8x1xf32> to vector<8x8xf32>
    %98 = arith.mulf %93, %97 : vector<8x8xf32>
    %99 = vector.extract_strided_slice %29 {offsets = [0, 24], sizes = [8, 8], strides = [1, 1]} : vector<8x32xf32> to vector<8x8xf32>
    %cst_52 = arith.constant dense<0.000000e+00> : vector<8x8xf32>
    %100 = tpu.matmul %98, %99, %cst_52 {dimension_numbers = #tpu.dot_dimension_numbers<[1], [0], [0], [1], [0, 0, 1, 1], [], []>} : vector<8x8xf32>, vector<8x8xf32>, vector<8x8xf32> -> vector<8x8xf32>
    %101 = vector.extract_strided_slice %15 {offsets = [24, 0], sizes = [8, 32], strides = [1, 1]} : vector<32x32xf32> to vector<8x32xf32>
    %cst_53 = arith.constant dense<0.000000e+00> : vector<8x32xf32>
    %102 = tpu.matmul %100, %101, %cst_53 {dimension_numbers = #tpu.dot_dimension_numbers<[1], [0], [0], [1], [0, 0, 1, 1], [], []>} : vector<8x8xf32>, vector<8x32xf32>, vector<8x32xf32> -> vector<8x32xf32>
    %103 = arith.addf %85, %102 : vector<8x32xf32>
    %cst_54 = arith.constant dense<0.000000e+00> : vector<8xf32>
    %104 = vector.multi_reduction <add>, %103, %cst_54 [1] : vector<8x32xf32> to vector<8xf32>
    %105 = vector.shape_cast %104 : vector<8xf32> to vector<8x1xf32>
    %cst_55 = arith.constant 3.200000e+01 : f32
    %106 = vector.broadcast %cst_55 : f32 to vector<8x1xf32>
    %107 = arith.divf %105, %106 : vector<8x1xf32>
    %108 = vector.broadcast %107 : vector<8x1xf32> to vector<8x32xf32>
    %109 = arith.subf %103, %108 : vector<8x32xf32>
    %110 = arith.mulf %109, %109 : vector<8x32xf32>
    %cst_56 = arith.constant dense<0.000000e+00> : vector<8xf32>
    %111 = vector.multi_reduction <add>, %110, %cst_56 [1] : vector<8x32xf32> to vector<8xf32>
    %112 = vector.shape_cast %111 : vector<8xf32> to vector<8x1xf32>
    %cst_57 = arith.constant 3.200000e+01 : f32
    %113 = vector.broadcast %cst_57 : f32 to vector<8x1xf32>
    %114 = arith.divf %112, %113 : vector<8x1xf32>
    %115 = vector.broadcast %107 : vector<8x1xf32> to vector<8x32xf32>
    %116 = arith.subf %103, %115 : vector<8x32xf32>
    %cst_58 = arith.constant 9.99999974E-6 : f32
    %117 = vector.broadcast %cst_58 : f32 to vector<8x1xf32>
    %118 = arith.addf %114, %117 : vector<8x1xf32>
    %119 = math.rsqrt %118 : vector<8x1xf32>
    %120 = vector.broadcast %119 : vector<8x1xf32> to vector<8x32xf32>
    %121 = arith.mulf %116, %120 : vector<8x32xf32>
    %122 = vector.broadcast %17 : vector<1x32xf32> to vector<8x32xf32>
    %123 = arith.mulf %121, %122 : vector<8x32xf32>
    %124 = vector.broadcast %18 : vector<1x32xf32> to vector<8x32xf32>
    %125 = arith.addf %123, %124 : vector<8x32xf32>
    %126 = arith.addf %125, %3 : vector<8x32xf32>
    %127 = arith.addf %5, %7 : vector<16x32xf32>
    %c0_59 = arith.constant 0 : index
    %c0_60 = arith.constant 0 : index
    %128 = vector.load %arg15[%c0_59, %c0_60] : memref<32x32xf32, #tpu.memory_space<vmem>>, vector<32x32xf32>
    %c0_61 = arith.constant 0 : index
    %c0_62 = arith.constant 0 : index
    %129 = vector.load %arg16[%c0_61, %c0_62] : memref<1x32xf32, #tpu.memory_space<vmem>>, vector<1x32xf32>
    %c0_63 = arith.constant 0 : index
    %c0_64 = arith.constant 0 : index
    %130 = vector.load %arg17[%c0_63, %c0_64] : memref<32x32xf32, #tpu.memory_space<vmem>>, vector<32x32xf32>
    %c0_65 = arith.constant 0 : index
    %c0_66 = arith.constant 0 : index
    %131 = vector.load %arg18[%c0_65, %c0_66] : memref<1x32xf32, #tpu.memory_space<vmem>>, vector<1x32xf32>
    %c0_67 = arith.constant 0 : index
    %c0_68 = arith.constant 0 : index
    %132 = vector.load %arg19[%c0_67, %c0_68] : memref<32x32xf32, #tpu.memory_space<vmem>>, vector<32x32xf32>
    %c0_69 = arith.constant 0 : index
    %c0_70 = arith.constant 0 : index
    %133 = vector.load %arg20[%c0_69, %c0_70] : memref<1x32xf32, #tpu.memory_space<vmem>>, vector<1x32xf32>
    %c0_71 = arith.constant 0 : index
    %c0_72 = arith.constant 0 : index
    %134 = vector.load %arg21[%c0_71, %c0_72] : memref<32x32xf32, #tpu.memory_space<vmem>>, vector<32x32xf32>
    %c0_73 = arith.constant 0 : index
    %c0_74 = arith.constant 0 : index
    %135 = vector.load %arg22[%c0_73, %c0_74] : memref<1x32xf32, #tpu.memory_space<vmem>>, vector<1x32xf32>
    %c0_75 = arith.constant 0 : index
    %c0_76 = arith.constant 0 : index
    %136 = vector.load %arg23[%c0_75, %c0_76] : memref<1x32xf32, #tpu.memory_space<vmem>>, vector<1x32xf32>
    %c0_77 = arith.constant 0 : index
    %c0_78 = arith.constant 0 : index
    %137 = vector.load %arg24[%c0_77, %c0_78] : memref<1x32xf32, #tpu.memory_space<vmem>>, vector<1x32xf32>
    %cst_79 = arith.constant dense<0.000000e+00> : vector<8x32xf32>
    %138 = tpu.matmul %126, %128, %cst_79 {dimension_numbers = #tpu.dot_dimension_numbers<[1], [0], [0], [1], [0, 0, 1, 1], [], []>} : vector<8x32xf32>, vector<32x32xf32>, vector<8x32xf32> -> vector<8x32xf32>
    %139 = vector.broadcast %129 : vector<1x32xf32> to vector<8x32xf32>
    %140 = arith.addf %138, %139 : vector<8x32xf32>
    %cst_80 = arith.constant 0.353553385 : f32
    %141 = vector.broadcast %cst_80 : f32 to vector<8x32xf32>
    %142 = arith.mulf %140, %141 : vector<8x32xf32>
    %cst_81 = arith.constant dense<0.000000e+00> : vector<16x32xf32>
    %143 = tpu.matmul %127, %130, %cst_81 {dimension_numbers = #tpu.dot_dimension_numbers<[1], [0], [0], [1], [0, 0, 1, 1], [], []>} : vector<16x32xf32>, vector<32x32xf32>, vector<16x32xf32> -> vector<16x32xf32>
    %144 = vector.broadcast %131 : vector<1x32xf32> to vector<16x32xf32>
    %145 = arith.addf %143, %144 : vector<16x32xf32>
    %cst_82 = arith.constant dense<0.000000e+00> : vector<16x32xf32>
    %146 = tpu.matmul %5, %132, %cst_82 {dimension_numbers = #tpu.dot_dimension_numbers<[1], [0], [0], [1], [0, 0, 1, 1], [], []>} : vector<16x32xf32>, vector<32x32xf32>, vector<16x32xf32> -> vector<16x32xf32>
    %147 = vector.broadcast %133 : vector<1x32xf32> to vector<16x32xf32>
    %148 = arith.addf %146, %147 : vector<16x32xf32>
    %149 = vector.broadcast %135 : vector<1x32xf32> to vector<8x32xf32>
    %150 = arith.addf %125, %149 : vector<8x32xf32>
    %151 = vector.extract_strided_slice %142 {offsets = [0, 0], sizes = [8, 8], strides = [1, 1]} : vector<8x32xf32> to vector<8x8xf32>
    %152 = vector.extract_strided_slice %145 {offsets = [0, 0], sizes = [16, 8], strides = [1, 1]} : vector<16x32xf32> to vector<16x8xf32>
    %cst_83 = arith.constant dense<0.000000e+00> : vector<8x16xf32>
    %153 = tpu.matmul %151, %152, %cst_83 {dimension_numbers = #tpu.dot_dimension_numbers<[1], [1], [0], [0], [0, 0, 1, 0], [], []>} : vector<8x8xf32>, vector<16x8xf32>, vector<8x16xf32> -> vector<8x16xf32>
    %cst_84 = arith.constant dense<0xFF800000> : vector<8xf32>
    %154 = vector.multi_reduction <maximumf>, %153, %cst_84 [1] : vector<8x16xf32> to vector<8xf32>
    %155 = vector.shape_cast %154 : vector<8xf32> to vector<8x1xf32>
    %156 = vector.broadcast %155 : vector<8x1xf32> to vector<8x16xf32>
    %157 = arith.subf %153, %156 : vector<8x16xf32>
    %158 = math.exp %157 : vector<8x16xf32>
    %cst_85 = arith.constant dense<0.000000e+00> : vector<8xf32>
    %159 = vector.multi_reduction <add>, %158, %cst_85 [1] : vector<8x16xf32> to vector<8xf32>
    %160 = vector.shape_cast %159 : vector<8xf32> to vector<8x1xf32>
    %161 = tpu.reciprocal %160 {approx = true} : vector<8x1xf32> -> vector<8x1xf32>
    %162 = vector.broadcast %161 : vector<8x1xf32> to vector<8x16xf32>
    %163 = arith.mulf %158, %162 : vector<8x16xf32>
    %164 = vector.extract_strided_slice %148 {offsets = [0, 0], sizes = [16, 8], strides = [1, 1]} : vector<16x32xf32> to vector<16x8xf32>
    %cst_86 = arith.constant dense<0.000000e+00> : vector<8x8xf32>
    %165 = tpu.matmul %163, %164, %cst_86 {dimension_numbers = #tpu.dot_dimension_numbers<[1], [0], [0], [1], [0, 0, 1, 1], [], []>} : vector<8x16xf32>, vector<16x8xf32>, vector<8x8xf32> -> vector<8x8xf32>
    %166 = vector.extract_strided_slice %134 {offsets = [0, 0], sizes = [8, 32], strides = [1, 1]} : vector<32x32xf32> to vector<8x32xf32>
    %cst_87 = arith.constant dense<0.000000e+00> : vector<8x32xf32>
    %167 = tpu.matmul %165, %166, %cst_87 {dimension_numbers = #tpu.dot_dimension_numbers<[1], [0], [0], [1], [0, 0, 1, 1], [], []>} : vector<8x8xf32>, vector<8x32xf32>, vector<8x32xf32> -> vector<8x32xf32>
    %168 = arith.addf %150, %167 : vector<8x32xf32>
    %169 = vector.extract_strided_slice %142 {offsets = [0, 8], sizes = [8, 8], strides = [1, 1]} : vector<8x32xf32> to vector<8x8xf32>
    %170 = vector.extract_strided_slice %145 {offsets = [0, 8], sizes = [16, 8], strides = [1, 1]} : vector<16x32xf32> to vector<16x8xf32>
    %cst_88 = arith.constant dense<0.000000e+00> : vector<8x16xf32>
    %171 = tpu.matmul %169, %170, %cst_88 {dimension_numbers = #tpu.dot_dimension_numbers<[1], [1], [0], [0], [0, 0, 1, 0], [], []>} : vector<8x8xf32>, vector<16x8xf32>, vector<8x16xf32> -> vector<8x16xf32>
    %cst_89 = arith.constant dense<0xFF800000> : vector<8xf32>
    %172 = vector.multi_reduction <maximumf>, %171, %cst_89 [1] : vector<8x16xf32> to vector<8xf32>
    %173 = vector.shape_cast %172 : vector<8xf32> to vector<8x1xf32>
    %174 = vector.broadcast %173 : vector<8x1xf32> to vector<8x16xf32>
    %175 = arith.subf %171, %174 : vector<8x16xf32>
    %176 = math.exp %175 : vector<8x16xf32>
    %cst_90 = arith.constant dense<0.000000e+00> : vector<8xf32>
    %177 = vector.multi_reduction <add>, %176, %cst_90 [1] : vector<8x16xf32> to vector<8xf32>
    %178 = vector.shape_cast %177 : vector<8xf32> to vector<8x1xf32>
    %179 = tpu.reciprocal %178 {approx = true} : vector<8x1xf32> -> vector<8x1xf32>
    %180 = vector.broadcast %179 : vector<8x1xf32> to vector<8x16xf32>
    %181 = arith.mulf %176, %180 : vector<8x16xf32>
    %182 = vector.extract_strided_slice %148 {offsets = [0, 8], sizes = [16, 8], strides = [1, 1]} : vector<16x32xf32> to vector<16x8xf32>
    %cst_91 = arith.constant dense<0.000000e+00> : vector<8x8xf32>
    %183 = tpu.matmul %181, %182, %cst_91 {dimension_numbers = #tpu.dot_dimension_numbers<[1], [0], [0], [1], [0, 0, 1, 1], [], []>} : vector<8x16xf32>, vector<16x8xf32>, vector<8x8xf32> -> vector<8x8xf32>
    %184 = vector.extract_strided_slice %134 {offsets = [8, 0], sizes = [8, 32], strides = [1, 1]} : vector<32x32xf32> to vector<8x32xf32>
    %cst_92 = arith.constant dense<0.000000e+00> : vector<8x32xf32>
    %185 = tpu.matmul %183, %184, %cst_92 {dimension_numbers = #tpu.dot_dimension_numbers<[1], [0], [0], [1], [0, 0, 1, 1], [], []>} : vector<8x8xf32>, vector<8x32xf32>, vector<8x32xf32> -> vector<8x32xf32>
    %186 = arith.addf %168, %185 : vector<8x32xf32>
    %187 = vector.extract_strided_slice %142 {offsets = [0, 16], sizes = [8, 8], strides = [1, 1]} : vector<8x32xf32> to vector<8x8xf32>
    %188 = vector.extract_strided_slice %145 {offsets = [0, 16], sizes = [16, 8], strides = [1, 1]} : vector<16x32xf32> to vector<16x8xf32>
    %cst_93 = arith.constant dense<0.000000e+00> : vector<8x16xf32>
    %189 = tpu.matmul %187, %188, %cst_93 {dimension_numbers = #tpu.dot_dimension_numbers<[1], [1], [0], [0], [0, 0, 1, 0], [], []>} : vector<8x8xf32>, vector<16x8xf32>, vector<8x16xf32> -> vector<8x16xf32>
    %cst_94 = arith.constant dense<0xFF800000> : vector<8xf32>
    %190 = vector.multi_reduction <maximumf>, %189, %cst_94 [1] : vector<8x16xf32> to vector<8xf32>
    %191 = vector.shape_cast %190 : vector<8xf32> to vector<8x1xf32>
    %192 = vector.broadcast %191 : vector<8x1xf32> to vector<8x16xf32>
    %193 = arith.subf %189, %192 : vector<8x16xf32>
    %194 = math.exp %193 : vector<8x16xf32>
    %cst_95 = arith.constant dense<0.000000e+00> : vector<8xf32>
    %195 = vector.multi_reduction <add>, %194, %cst_95 [1] : vector<8x16xf32> to vector<8xf32>
    %196 = vector.shape_cast %195 : vector<8xf32> to vector<8x1xf32>
    %197 = tpu.reciprocal %196 {approx = true} : vector<8x1xf32> -> vector<8x1xf32>
    %198 = vector.broadcast %197 : vector<8x1xf32> to vector<8x16xf32>
    %199 = arith.mulf %194, %198 : vector<8x16xf32>
    %200 = vector.extract_strided_slice %148 {offsets = [0, 16], sizes = [16, 8], strides = [1, 1]} : vector<16x32xf32> to vector<16x8xf32>
    %cst_96 = arith.constant dense<0.000000e+00> : vector<8x8xf32>
    %201 = tpu.matmul %199, %200, %cst_96 {dimension_numbers = #tpu.dot_dimension_numbers<[1], [0], [0], [1], [0, 0, 1, 1], [], []>} : vector<8x16xf32>, vector<16x8xf32>, vector<8x8xf32> -> vector<8x8xf32>
    %202 = vector.extract_strided_slice %134 {offsets = [16, 0], sizes = [8, 32], strides = [1, 1]} : vector<32x32xf32> to vector<8x32xf32>
    %cst_97 = arith.constant dense<0.000000e+00> : vector<8x32xf32>
    %203 = tpu.matmul %201, %202, %cst_97 {dimension_numbers = #tpu.dot_dimension_numbers<[1], [0], [0], [1], [0, 0, 1, 1], [], []>} : vector<8x8xf32>, vector<8x32xf32>, vector<8x32xf32> -> vector<8x32xf32>
    %204 = arith.addf %186, %203 : vector<8x32xf32>
    %205 = vector.extract_strided_slice %142 {offsets = [0, 24], sizes = [8, 8], strides = [1, 1]} : vector<8x32xf32> to vector<8x8xf32>
    %206 = vector.extract_strided_slice %145 {offsets = [0, 24], sizes = [16, 8], strides = [1, 1]} : vector<16x32xf32> to vector<16x8xf32>
    %cst_98 = arith.constant dense<0.000000e+00> : vector<8x16xf32>
    %207 = tpu.matmul %205, %206, %cst_98 {dimension_numbers = #tpu.dot_dimension_numbers<[1], [1], [0], [0], [0, 0, 1, 0], [], []>} : vector<8x8xf32>, vector<16x8xf32>, vector<8x16xf32> -> vector<8x16xf32>
    %cst_99 = arith.constant dense<0xFF800000> : vector<8xf32>
    %208 = vector.multi_reduction <maximumf>, %207, %cst_99 [1] : vector<8x16xf32> to vector<8xf32>
    %209 = vector.shape_cast %208 : vector<8xf32> to vector<8x1xf32>
    %210 = vector.broadcast %209 : vector<8x1xf32> to vector<8x16xf32>
    %211 = arith.subf %207, %210 : vector<8x16xf32>
    %212 = math.exp %211 : vector<8x16xf32>
    %cst_100 = arith.constant dense<0.000000e+00> : vector<8xf32>
    %213 = vector.multi_reduction <add>, %212, %cst_100 [1] : vector<8x16xf32> to vector<8xf32>
    %214 = vector.shape_cast %213 : vector<8xf32> to vector<8x1xf32>
    %215 = tpu.reciprocal %214 {approx = true} : vector<8x1xf32> -> vector<8x1xf32>
    %216 = vector.broadcast %215 : vector<8x1xf32> to vector<8x16xf32>
    %217 = arith.mulf %212, %216 : vector<8x16xf32>
    %218 = vector.extract_strided_slice %148 {offsets = [0, 24], sizes = [16, 8], strides = [1, 1]} : vector<16x32xf32> to vector<16x8xf32>
    %cst_101 = arith.constant dense<0.000000e+00> : vector<8x8xf32>
    %219 = tpu.matmul %217, %218, %cst_101 {dimension_numbers = #tpu.dot_dimension_numbers<[1], [0], [0], [1], [0, 0, 1, 1], [], []>} : vector<8x16xf32>, vector<16x8xf32>, vector<8x8xf32> -> vector<8x8xf32>
    %220 = vector.extract_strided_slice %134 {offsets = [24, 0], sizes = [8, 32], strides = [1, 1]} : vector<32x32xf32> to vector<8x32xf32>
    %cst_102 = arith.constant dense<0.000000e+00> : vector<8x32xf32>
    %221 = tpu.matmul %219, %220, %cst_102 {dimension_numbers = #tpu.dot_dimension_numbers<[1], [0], [0], [1], [0, 0, 1, 1], [], []>} : vector<8x8xf32>, vector<8x32xf32>, vector<8x32xf32> -> vector<8x32xf32>
    %222 = arith.addf %204, %221 : vector<8x32xf32>
    %cst_103 = arith.constant dense<0.000000e+00> : vector<8xf32>
    %223 = vector.multi_reduction <add>, %222, %cst_103 [1] : vector<8x32xf32> to vector<8xf32>
    %224 = vector.shape_cast %223 : vector<8xf32> to vector<8x1xf32>
    %cst_104 = arith.constant 3.200000e+01 : f32
    %225 = vector.broadcast %cst_104 : f32 to vector<8x1xf32>
    %226 = arith.divf %224, %225 : vector<8x1xf32>
    %227 = vector.broadcast %226 : vector<8x1xf32> to vector<8x32xf32>
    %228 = arith.subf %222, %227 : vector<8x32xf32>
    %229 = arith.mulf %228, %228 : vector<8x32xf32>
    %cst_105 = arith.constant dense<0.000000e+00> : vector<8xf32>
    %230 = vector.multi_reduction <add>, %229, %cst_105 [1] : vector<8x32xf32> to vector<8xf32>
    %231 = vector.shape_cast %230 : vector<8xf32> to vector<8x1xf32>
    %cst_106 = arith.constant 3.200000e+01 : f32
    %232 = vector.broadcast %cst_106 : f32 to vector<8x1xf32>
    %233 = arith.divf %231, %232 : vector<8x1xf32>
    %234 = vector.broadcast %226 : vector<8x1xf32> to vector<8x32xf32>
    %235 = arith.subf %222, %234 : vector<8x32xf32>
    %cst_107 = arith.constant 9.99999974E-6 : f32
    %236 = vector.broadcast %cst_107 : f32 to vector<8x1xf32>
    %237 = arith.addf %233, %236 : vector<8x1xf32>
    %238 = math.rsqrt %237 : vector<8x1xf32>
    %239 = vector.broadcast %238 : vector<8x1xf32> to vector<8x32xf32>
    %240 = arith.mulf %235, %239 : vector<8x32xf32>
    %241 = vector.broadcast %136 : vector<1x32xf32> to vector<8x32xf32>
    %242 = arith.mulf %240, %241 : vector<8x32xf32>
    %243 = vector.broadcast %137 : vector<1x32xf32> to vector<8x32xf32>
    %244 = arith.addf %242, %243 : vector<8x32xf32>
    %c0_108 = arith.constant 0 : index
    %c0_109 = arith.constant 0 : index
    %c0_110 = arith.constant 0 : index
    %245 = vector.load %arg25[%c0_108, %c0_109, %c0_110] : memref<1x8x32xf32, #tpu.memory_space<vmem>>, vector<1x8x32xf32>
    %246 = vector.shape_cast %245 : vector<1x8x32xf32> to vector<8x32xf32>
    %247 = vector.shape_cast %244 : vector<8x32xf32> to vector<1x8x32xf32>
    tpu.vector_store %arg25[%c0_108, %c0_109, %c0_110], %247 {strides = array<i32>} : memref<1x8x32xf32, #tpu.memory_space<vmem>>, vector<1x8x32xf32>,
    return
  }
  func.func @transform_0(%arg0: i32) -> (i32, i32, i32) {
    %c0_i32 = arith.constant 0 : i32
    %c0_i32_0 = arith.constant 0 : i32
    %c0_i32_1 = arith.constant 0 : i32
    return %arg0, %c0_i32, %c0_i32_0 : i32, i32, i32
  }
  func.func @transform_1(%arg0: i32) -> (i32, i32, i32) {
    %c0_i32 = arith.constant 0 : i32
    %c0_i32_0 = arith.constant 0 : i32
    %c0_i32_1 = arith.constant 0 : i32
    return %arg0, %c0_i32, %c0_i32_0 : i32, i32, i32
  }
  func.func @transform_2(%arg0: i32) -> (i32, i32, i32) {
    %c0_i32 = arith.constant 0 : i32
    %c0_i32_0 = arith.constant 0 : i32
    %c0_i32_1 = arith.constant 0 : i32
    return %arg0, %c0_i32, %c0_i32_0 : i32, i32, i32
  }
  func.func @transform_3(%arg0: i32) -> (i32, i32, i32) {
    %c0_i32 = arith.constant 0 : i32
    %c0_i32_0 = arith.constant 0 : i32
    %c0_i32_1 = arith.constant 0 : i32
    return %arg0, %c0_i32, %c0_i32_0 : i32, i32, i32
  }
  func.func @transform_4(%arg0: i32) -> (i32, i32) {
    %c0_i32 = arith.constant 0 : i32
    %c0_i32_0 = arith.constant 0 : i32
    %c0_i32_1 = arith.constant 0 : i32
    return %c0_i32, %c0_i32_0 : i32, i32
  }
  func.func @transform_5(%arg0: i32) -> (i32, i32) {
    %c0_i32 = arith.constant 0 : i32
    %c0_i32_0 = arith.constant 0 : i32
    %c0_i32_1 = arith.constant 0 : i32
    return %c0_i32, %c0_i32_0 : i32, i32
  }
  func.func @transform_6(%arg0: i32) -> (i32, i32) {
    %c0_i32 = arith.constant 0 : i32
    %c0_i32_0 = arith.constant 0 : i32
    %c0_i32_1 = arith.constant 0 : i32
    return %c0_i32, %c0_i32_0 : i32, i32
  }
  func.func @transform_7(%arg0: i32) -> (i32, i32) {
    %c0_i32 = arith.constant 0 : i32
    %c0_i32_0 = arith.constant 0 : i32
    %c0_i32_1 = arith.constant 0 : i32
    return %c0_i32, %c0_i32_0 : i32, i32
  }
  func.func @transform_8(%arg0: i32) -> (i32, i32) {
    %c0_i32 = arith.constant 0 : i32
    %c0_i32_0 = arith.constant 0 : i32
    %c0_i32_1 = arith.constant 0 : i32
    return %c0_i32, %c0_i32_0 : i32, i32
  }
  func.func @transform_9(%arg0: i32) -> (i32, i32) {
    %c0_i32 = arith.constant 0 : i32
    %c0_i32_0 = arith.constant 0 : i32
    %c0_i32_1 = arith.constant 0 : i32
    return %c0_i32, %c0_i32_0 : i32, i32
  }
  func.func @transform_10(%arg0: i32) -> (i32, i32) {
    %c0_i32 = arith.constant 0 : i32
    %c0_i32_0 = arith.constant 0 : i32
    %c0_i32_1 = arith.constant 0 : i32
    return %c0_i32, %c0_i32_0 : i32, i32
  }
  func.func @transform_11(%arg0: i32) -> (i32, i32) {
    %c0_i32 = arith.constant 0 : i32
    %c0_i32_0 = arith.constant 0 : i32
    %c0_i32_1 = arith.constant 0 : i32
    return %c0_i32, %c0_i32_0 : i32, i32
  }
  func.func @transform_12(%arg0: i32) -> (i32, i32) {
    %c0_i32 = arith.constant 0 : i32
    %c0_i32_0 = arith.constant 0 : i32
    %c0_i32_1 = arith.constant 0 : i32
    return %c0_i32, %c0_i32_0 : i32, i32
  }
  func.func @transform_13(%arg0: i32) -> (i32, i32) {
    %c0_i32 = arith.constant 0 : i32
    %c0_i32_0 = arith.constant 0 : i32
    %c0_i32_1 = arith.constant 0 : i32
    return %c0_i32, %c0_i32_0 : i32, i32
  }
  func.func @transform_14(%arg0: i32) -> (i32, i32) {
    %c0_i32 = arith.constant 0 : i32
    %c0_i32_0 = arith.constant 0 : i32
    %c0_i32_1 = arith.constant 0 : i32
    return %c0_i32, %c0_i32_0 : i32, i32
  }
  func.func @transform_15(%arg0: i32) -> (i32, i32) {
    %c0_i32 = arith.constant 0 : i32
    %c0_i32_0 = arith.constant 0 : i32
    %c0_i32_1 = arith.constant 0 : i32
    return %c0_i32, %c0_i32_0 : i32, i32
  }
  func.func @transform_16(%arg0: i32) -> (i32, i32) {
    %c0_i32 = arith.constant 0 : i32
    %c0_i32_0 = arith.constant 0 : i32
    %c0_i32_1 = arith.constant 0 : i32
    return %c0_i32, %c0_i32_0 : i32, i32
  }
  func.func @transform_17(%arg0: i32) -> (i32, i32) {
    %c0_i32 = arith.constant 0 : i32
    %c0_i32_0 = arith.constant 0 : i32
    %c0_i32_1 = arith.constant 0 : i32
    return %c0_i32, %c0_i32_0 : i32, i32
  }
  func.func @transform_18(%arg0: i32) -> (i32, i32) {
    %c0_i32 = arith.constant 0 : i32
    %c0_i32_0 = arith.constant 0 : i32
    %c0_i32_1 = arith.constant 0 : i32
    return %c0_i32, %c0_i32_0 : i32, i32
  }
  func.func @transform_19(%arg0: i32) -> (i32, i32) {
    %c0_i32 = arith.constant 0 : i32
    %c0_i32_0 = arith.constant 0 : i32
    %c0_i32_1 = arith.constant 0 : i32
    return %c0_i32, %c0_i32_0 : i32, i32
  }
  func.func @transform_20(%arg0: i32) -> (i32, i32) {
    %c0_i32 = arith.constant 0 : i32
    %c0_i32_0 = arith.constant 0 : i32
    %c0_i32_1 = arith.constant 0 : i32
    return %c0_i32, %c0_i32_0 : i32, i32
  }
  func.func @transform_21(%arg0: i32) -> (i32, i32) {
    %c0_i32 = arith.constant 0 : i32
    %c0_i32_0 = arith.constant 0 : i32
    %c0_i32_1 = arith.constant 0 : i32
    return %c0_i32, %c0_i32_0 : i32, i32
  }
  func.func @transform_22(%arg0: i32) -> (i32, i32) {
    %c0_i32 = arith.constant 0 : i32
    %c0_i32_0 = arith.constant 0 : i32
    %c0_i32_1 = arith.constant 0 : i32
    return %c0_i32, %c0_i32_0 : i32, i32
  }
  func.func @transform_23(%arg0: i32) -> (i32, i32) {
    %c0_i32 = arith.constant 0 : i32
    %c0_i32_0 = arith.constant 0 : i32
    %c0_i32_1 = arith.constant 0 : i32
    return %c0_i32, %c0_i32_0 : i32, i32
  }
  func.func @transform_24(%arg0: i32) -> (i32, i32, i32) {
    %c0_i32 = arith.constant 0 : i32
    %c0_i32_0 = arith.constant 0 : i32
    %c0_i32_1 = arith.constant 0 : i32
    return %arg0, %c0_i32, %c0_i32_0 : i32, i32, i32
  }
}

</mosaic_0001>

<bundles_post_ra>
// kernel: tpu_custom_call.1
= control target key start
LH: loop header
LB: loop body
LE: loop exit
PB: predicated region body
PF: predicated region fallthrough
CT: control target
= control target key end

     0   :  { %s3641_s0 = inlined_call_operand.hbm [shape: f32[2,8,32], index: 0, kind: input, shape index: {}]   ;;  %s3642_s1 = inlined_call_operand.hbm [shape: f32[2,8,32], index: 1, kind: input, shape index: {}]   ;;  %s3643_s2 = inlined_call_operand.hbm [shape: f32[2,16,32], index: 2, kind: input, shape index: {}]   ;;  %s3644_s3 = inlined_call_operand.hbm [shape: f32[2,16,32], index: 3, kind: input, shape index: {}]   ;;  %s3645_s4 = inlined_call_operand.hbm [shape: f32[32,32], index: 4, kind: input, shape index: {}]   ;;  %s3646_s5 = inlined_call_operand.vmem [shape: f32[1,32], index: 5, kind: input, shape index: {}]   ;;  %s3647_s6 = inlined_call_operand.hbm [shape: f32[32,32], index: 6, kind: input, shape index: {}]   ;;  %s3648_s7 = inlined_call_operand.vmem [shape: f32[1,32], index: 7, kind: input, shape index: {}]   ;;  %s3649_s8 = inlined_call_operand.hbm [shape: f32[32,32], index: 8, kind: input, shape index: {}]   ;;  %s3650_s9 = inlined_call_operand.vmem [shape: f32[1,32], index: 9, kind: input, shape index: {}]   ;;  %s3651_s10 = inlined_call_operand.hbm [shape: f32[32,32], index: 10, kind: input, shape index: {}]   ;;  %s3652_s11 = inlined_call_operand.vmem [shape: f32[1,32], index: 11, kind: input, shape index: {}]   ;;  %s3653_s12 = inlined_call_operand.vmem [shape: f32[1,32], index: 12, kind: input, shape index: {}]   ;;  %s3654_s13 = inlined_call_operand.vmem [shape: f32[1,32], index: 13, kind: input, shape index: {}]   ;;  %s3655_s14 = inlined_call_operand.hbm [shape: f32[32,32], index: 14, kind: input, shape index: {}]   ;;  %s3656_s15 = inlined_call_operand.vmem [shape: f32[1,32], index: 15, kind: input, shape index: {}]   ;;  %s3657_s16 = inlined_call_operand.hbm [shape: f32[32,32], index: 16, kind: input, shape index: {}]   ;;  %s3658_s17 = inlined_call_operand.vmem [shape: f32[1,32], index: 17, kind: input, shape index: {}]   ;;  %s3659_s18 = inlined_call_operand.hbm [shape: f32[32,32], index: 18, kind: input, shape index: {}]   ;;  %s3660_s19 = inlined_call_operand.vmem [shape: f32[1,32], index: 19, kind: input, shape index: {}]   ;;  %s3661_s20 = inlined_call_operand.hbm [shape: f32[32,32], index: 20, kind: input, shape index: {}]   ;;  %s3662_s21 = inlined_call_operand.vmem [shape: f32[1,32], index: 21, kind: input, shape index: {}]   ;;  %s3663_s22 = inlined_call_operand.vmem [shape: f32[1,32], index: 22, kind: input, shape index: {}]   ;;  %s3664_s23 = inlined_call_operand.vmem [shape: f32[1,32], index: 23, kind: input, shape index: {}]   ;;  %s3665_s24 = inlined_call_operand.hbm [shape: f32[2,8,32], index: 24, kind: output, shape index: {}]  }
   0x1   :  { %3687 = sst [smem:[#allocation38_spill]] %s3641_s0 }
   0x2   :  { %3688 = sst [smem:[#allocation39_spill]] %s3642_s1 }
   0x3   :  { %3689 = sst [smem:[#allocation40_spill]] %s3643_s2 }
   0x4   :  { %3690 = sst [smem:[#allocation41_spill]] %s3644_s3 }
   0x5   :  { %3691 = sst [smem:[#allocation42_spill]] %s3645_s4 }
   0x6   :  { %3692 = sst [smem:[#allocation43_spill]] %s3646_s5 }
   0x7   :  { %3693 = sst [smem:[#allocation44_spill]] %s3647_s6 }
   0x8   :  { %3694 = sst [smem:[#allocation45_spill]] %s3648_s7 }
   0x9   :  { %3695 = sst [smem:[#allocation46_spill]] %s3649_s8 }
   0xa   :  { %3696 = sst [smem:[#allocation47_spill]] %s3650_s9 }
   0xb   :  { %3697 = sst [smem:[#allocation48_spill]] %s3651_s10 }
   0xc   :  { %3698 = sst [smem:[#allocation49_spill]] %s3652_s11 }
   0xd   :  { %3699 = sst [smem:[#allocation50_spill]] %s3653_s12 }
   0xe   :  { %3700 = sst [smem:[#allocation51_spill]] %s3654_s13 }
   0xf   :  { %3701 = sst [smem:[#allocation52_spill]] %s3655_s14 }
  0x10   :  { %3702 = sst [smem:[#allocation53_spill]] %s3656_s15 }
  0x11   :  { %3703 = sst [smem:[#allocation54_spill]] %s3657_s16 }
  0x12   :  { %3704 = sst [smem:[#allocation55_spill]] %s3658_s17 }
  0x13   :  { %3705 = sst [smem:[#allocation56_spill]] %s3659_s18 }
  0x14   :  { %3706 = sst [smem:[#allocation57_spill]] %s3660_s19 }
  0x15   :  { %3707 = sst [smem:[#allocation58_spill]] %s3661_s20 }
  0x16   :  { %3708 = sst [smem:[#allocation59_spill]] %s3662_s21 }
  0x17   :  { %3709 = sst [smem:[#allocation60_spill]] %s3663_s22 }
  0x18   :  { %3710 = sst [smem:[#allocation61_spill]] %s3664_s23 }
  0x19   :  { %3711 = sst [smem:[#allocation62_spill]] %s3665_s24 }
  0x1a   :  { %29 = vsyncpa [#allocation3], 0 }
  0x1b   :  { %31 = vsyncpa [#allocation3 + $0x1], 0 }
  0x1c   :  { %32 = vsyncpa [#allocation6], 0 }
  0x1d   :  { %34 = vsyncpa [#allocation6 + $0x1], 0 }
  0x1e   :  { %35 = vsyncpa [#allocation9], 0 }
  0x1f   :  { %37 = vsyncpa [#allocation9 + $0x1], 0 }
  0x20   :  { %38 = vsyncpa [#allocation12], 0 }
  0x21   :  { %39 = vsyncpa [#allocation15], 0 }
  0x22   :  { %40 = vsyncpa [#allocation18], 0 }
  0x23   :  { %41 = vsyncpa [#allocation21], 0 }
  0x24   :  { %42 = vsyncpa [#allocation4], 0 }
  0x25   :  { %44 = vsyncpa [#allocation4 + $0x1], 0  ;;  %s3157_s5 = smov 0   ;;  %s3159_s26 = smov 0  }
  0x26   :  { %s3161_s27 = smov 0   ;;  %s3163_s28 = smov 0  }
  0x27 LB: > { %3712 = sst [smem:[#allocation32_spill]] %s3004_s5  ;;  %s3181_s7 = sadd.s32 4294967295, %s3016_s28   ;;  %s3016_s28 = sphi %s3163_s28, %s3768_s28   ;;  %s3012_s27 = sphi %s3161_s27, %s3773_s27   ;;  %s3008_s26 = sphi %s3159_s26, %s3772_s26   ;;  %s3004_s5 = sphi %s3157_s5, %s3771_s5  }
  0x28   : > { %3713 = sst [smem:[#allocation33_spill]] %s3012_s27  ;;  %p2265_p0 = scmp.ge.s32.totalorder %s3016_s28, 1 }
  0x29   : > { %s3714_s29 = sld [smem:[#allocation42_spill]]  ;;  %p3683_p1 = scmp.eq.s32.totalorder %s3181_s7, 0 }
  0x2a   : > { %p605_p2 = scmp.lt.s32.totalorder %s3016_s28, 3  ;;  %s3018_s3 = smov [#allocation10]  }
  0x2b   : > { %s618_s25 = sshll.u32 %s3018_s3, 4  ;;  %s3716_s1 = sld [smem:[#allocation44_spill]]  ;;  %s619_s25 = int_to_ptr.vmem [resolvable:$true] %s618_s25 }
  0x2c   : > { %p3186_p3 = pnand %p2265_p0, %p605_p2  ;;  %s3718_s10 = sld [smem:[#allocation48_spill]] }
  0x2d   : > { %s3019_s24 = smov [#allocation11]   ;;  %s3671_s21 = smov 128  }
  0x2e   : > { %p2391_p4 = pneg %p3186_p3  ;;  %s635_s22 = sshll.u32 %s3019_s24, 4  ;;  %s636_s22 = int_to_ptr.vmem [resolvable:$true] %s635_s22 }
  0x2f   : > { %s616_s0 = sshll.u32 %s3714_s29, 4  ;;  %s3673_s8 = smov 8   ;;  %s617_s0 = int_to_ptr.hbm [resolvable:$true] %s616_s0 }
  0x30   : > { %p3198_p6 = pnand %p2391_p4, %p3683_p1  ;;  %s3719_s16 = sld [smem:[#allocation54_spill]] }
  0x31   : > { %s633_s6 = sshll.u32 %s3716_s1, 4  ;;  %s3022_s1 = smov [#allocation14]   ;;  %s634_s6 = int_to_ptr.hbm [resolvable:$true] %s633_s6 }
  0x32   : > { %s667_s3 = sshll.u32 %s3718_s10, 4  ;;  %s3230_s29 = sadd.s32 1, %s3016_s28   ;;  %s668_s3 = int_to_ptr.hbm [resolvable:$true] %s667_s3 }
  0x33   : > { %2394 = dma.hbm_to_vmem [thread:$0]  (!%p3198_p6), %s617_s0, 512, %s619_s25, [#allocation9], %s3671_s21, %s3671_s21, %s3673_s8  }
  0x34   : > { %2397 = dma.hbm_to_vmem [thread:$0]  (!%p3198_p6), %s634_s6, 512, %s636_s22, [#allocation12], %s3671_s21, %s3671_s21, %s3673_s8  }
  0x35   : > { %s669_s0 = sshll.u32 %s3022_s1, 4  ;;  %s3023_s22 = smov [#allocation17]   ;;  %s670_s0 = int_to_ptr.vmem [resolvable:$true] %s669_s0 }
  0x36   : > { %s707_s4 = sshll.u32 %s3719_s16, 4  ;;  %s709_s25 = sshll.u32 %s3023_s22, 4  ;;  %s708_s4 = int_to_ptr.hbm [resolvable:$true] %s707_s4  ;;  %s710_s25 = int_to_ptr.vmem [resolvable:$true] %s709_s25 }
  0x37   : > { %2403 = dma.hbm_to_vmem [thread:$0]  (!%p3198_p6), %s668_s3, 512, %s670_s0, [#allocation15], %s3671_s21, %s3671_s21, %s3673_s8  }
  0x38   : > { %2409 = dma.hbm_to_vmem [thread:$0]  (!%p3198_p6), %s708_s4, 512, %s710_s25, [#allocation18], %s3671_s21, %s3671_s21, %s3673_s8  }
  0x39   : > { %s2264_s6 = sadd.s32 4294967294, %s3016_s28   ;;  %3720 = sst [smem:[#allocation34_spill]] %s3230_s29 }
  0x3a   : > { %s54_s23 = ssub.s32 %s3016_s28, %s3230_s29  ;;  %s57_s24 = sadd.s32 1, %s3012_s27 }
  0x3b   : > { %p55_p7 = scmp.eq.s32.totalorder %s54_s23, 0  ;;  %p64_p8 = scmp.ne.s32.totalorder %s3012_s27, %s3008_s26 }
  0x3c   : > { %p65_p9 = scmp.eq.s32.totalorder %s3016_s28, 0  ;;  %p70_p10 = scmp.ne.s32.totalorder %s3008_s26, %s3004_s5 }
  0x3d   : > { %s3241_s3 = scalar_select %p55_p7, %s3012_s27, %s57_s24  }
  0x3e   : > { %p66_p11 = por %p65_p9, %p64_p8  ;;  %p3245_p12 = por %p3683_p1, %p70_p10 }
  0x3f   : > { %3721 = sst [smem:[#allocation35_spill]] %s3241_s3  ;;  %p592_p13 = scmp.eq.s32.totalorder %s3181_s7, 1 }
  0x40   : > { %p598_p0 = scmp.eq.s32.totalorder %s2264_s6, 1  ;;  %p2441_p2 = scmp.lt.s32.totalorder %s3016_s28, 2 }
  0x41   : > { %s3252_s4 = sand.u32 1, %s3012_s27   ;;  %p3254_p4 = por %p592_p13, %p64_p8 }
  0x42   : > { %p3258_p7 = por %p598_p0, %p70_p10  ;;  %s3682_s25 = sshll.u32 %s3252_s4, 3 }
  0x43   : > { %s3723_s0 = scalar_select %p3254_p4, 1, 0 }
  0x44   : > { %s3725_s22 = scalar_select %p3258_p7, 1, 0 }
  0x45   : > { %3724 = sst [smem:[#allocation36_spill]] %s3723_s0  ;;  %s3685_s23 = sshll.u32 %s3016_s28, 3 }
  0x46   : > { %3726 = sst [smem:[#allocation37_spill]] %s3725_s22  ;;  %p3264_p9 = pnand %p2441_p2, %p66_p11 }
  0x47   : > { %s3684_s6 = sand.u32 1, %s3016_s28   ;;  %s3728_s10 = sld [smem:[#allocation39_spill]] }
  0x48   : > { %s789_s27 = scalar_lea.vmem [#allocation5], %s3682_s25  ;;  %s3278_s22 = scalar_lea.sflag [#allocation6], %s3684_s6 }
  0x49   : > { %s797_s29 = sshll.u32 %s789_s27, 4  ;;  %p2686_p10 = pneg %p3264_p9  ;;  %s798_s29 = int_to_ptr.vmem [resolvable:$true] %s797_s29 }
  0x4d   : > { %s793_s16 = scalar_lea.hbm %s3728_s10, %s3685_s23  ;;  %s2689_s8 = scalar_lea.hbm %s3728_s10, 16 }
  0x4e   : > { %s795_s3 = sshll.u32 %s793_s16, 4  ;;  %s796_s3 = int_to_ptr.hbm [resolvable:$true] %s795_s3 }
  0x4f   : > { %s2682_s5 = sshra.s32 %s796_s3, 4  ;;  %s2683_s5 = int_to_ptr.hbm [resolvable:$true] %s2682_s5 }
  0x50   : > { %s2684_s0 = scalar_lea.hbm %s2683_s5, 8  ;;  %p2690_p0 = scmp.lt.s32.totalorder %s2683_s5, %s3728_s10 }
  0x51   : > { %p2685_p8 = scmp.ne.s32.totalorder %s2683_s5, %s2684_s0  ;;  %p2691_p2 = scmp.lt.s32.totalorder %s2689_s8, %s2684_s0 }
  0x53   : > { %p2687_p11 = pnand %p2686_p10, %p2685_p8  ;;  %p2692_p5 = por %p2691_p2, %p2690_p0 }
  0x55   : > { %p2688_p13 = pneg %p2687_p11 }
  0x57   : > { %p2693_p1 = pnand %p2692_p5, %p2688_p13 }
  0x59   : > { %2696 = shalt.err (!%p2693_p1)
}
  0x5a   : > { %2422 = dma.hbm_to_vmem [thread:$0]  (!%p3264_p9), %s796_s3, 128, %s798_s29, %s3278_s22  }
  0x5b   : > { %s2279_s6 = sshll.u32 %s3252_s4, 4  ;;  %s3729_s25 = sld [smem:[#allocation46_spill]] }
  0x5c   : > { %s808_s23 = scalar_lea.vmem [#allocation7], %s2279_s6  ;;  %s830_s19 = scalar_lea.vmem [#allocation8], %s2279_s6 }
  0x5d   : > { %s816_s15 = sshll.u32 %s808_s23, 4  ;;  %s838_s21 = sshll.u32 %s830_s19, 4  ;;  %s3295_s15 = int_to_ptr.vmem [resolvable:$true] %s816_s15  ;;  %s3297_s21 = int_to_ptr.vmem [resolvable:$true] %s838_s21 }
  0x5e   : > { %s3024_s8 = smov [#allocation13]   ;;  %s3730_s14 = sld [smem:[#allocation52_spill]] }
  0x5f   : > { %s652_s27 = sshll.u32 %s3024_s8, 4  ;;  %s3731_s19 = smov 8   ;;  %s653_s27 = int_to_ptr.vmem [resolvable:$true] %s652_s27 }
  0x60   : > { %s3732_s6 = smov 128   ;;  %s3025_s10 = smov [#allocation16]  }
  0x61   : > { %s650_s16 = sshll.u32 %s3729_s25, 4  ;;  %s692_s5 = sshll.u32 %s3025_s10, 4  ;;  %s651_s16 = int_to_ptr.hbm [resolvable:$true] %s650_s16  ;;  %s693_s5 = int_to_ptr.vmem [resolvable:$true] %s692_s5 }
  0x62   : > { %2400 = dma.hbm_to_vmem [thread:$0]  (!%p3198_p6), %s651_s16, 512, %s653_s27, [#allocation12], %s3732_s6, %s3732_s6, %s3731_s19  }
  0x63   : > { %s3733_s18 = sld [smem:[#allocation56_spill]]  ;;  %s3026_s27 = smov [#allocation19]  }
  0x64   : > { %s690_s23 = sshll.u32 %s3730_s14, 4  ;;  %s3734_s20 = sld [smem:[#allocation58_spill]]  ;;  %s691_s23 = int_to_ptr.hbm [resolvable:$true] %s690_s23 }
  0x65   : > { %2406 = dma.hbm_to_vmem [thread:$0]  (!%p3198_p6), %s691_s23, 512, %s693_s5, [#allocation15], %s3732_s6, %s3732_s6, %s3731_s19  }
  0x66   : > { %s726_s10 = sshll.u32 %s3026_s27, 4  ;;  %s3027_s0 = smov [#allocation20]   ;;  %s727_s10 = int_to_ptr.vmem [resolvable:$true] %s726_s10 }
  0x67   : > { %s743_s25 = sshll.u32 %s3027_s0, 4  ;;  %s3735_s23 = sshll.u32 %s3016_s28, 3  ;;  %s744_s25 = int_to_ptr.vmem [resolvable:$true] %s743_s25 }
  0x68   : > { %s3736_s3 = sld [smem:[#allocation38_spill]]  ;;  %s3737_s14 = sshll.u32 %s3252_s4, 3 }
  0x69   : > { %s724_s8 = sshll.u32 %s3733_s18, 4  ;;  %s770_s18 = scalar_lea.vmem [#allocation2], %s3737_s14  ;;  %s725_s8 = int_to_ptr.hbm [resolvable:$true] %s724_s8 }
  0x6a   : > { %s741_s16 = sshll.u32 %s3734_s20, 4  ;;  %s778_s20 = sshll.u32 %s770_s18, 4  ;;  %s742_s16 = int_to_ptr.hbm [resolvable:$true] %s741_s16  ;;  %s779_s20 = int_to_ptr.vmem [resolvable:$true] %s778_s20 }
  0x6b   : > { %2412 = dma.hbm_to_vmem [thread:$0]  (!%p3198_p6), %s725_s8, 512, %s727_s10, [#allocation18], %s3732_s6, %s3732_s6, %s3731_s19  }
  0x6c   : > { %2415 = dma.hbm_to_vmem [thread:$0]  (!%p3198_p6), %s742_s16, 512, %s744_s25, [#allocation21], %s3732_s6, %s3732_s6, %s3731_s19  }
  0x6d   : > { %s2347_s8 = sshll.u32 %s3016_s28, 4  ;;  %s767_s10 = scalar_lea.sflag [#allocation3], %s3252_s4 }
  0x6e   : > { %s774_s27 = scalar_lea.hbm %s3736_s3, %s3735_s23  ;;  %s2839_s23 = scalar_lea.hbm %s3736_s3, 16 }
  0x6f   : > { %s776_s17 = sshll.u32 %s774_s27, 4  ;;  %s777_s17 = int_to_ptr.hbm [resolvable:$true] %s776_s17 }
  0x70   : > { %s2832_s0 = sshra.s32 %s777_s17, 4  ;;  %s2833_s0 = int_to_ptr.hbm [resolvable:$true] %s2832_s0 }
  0x71   : > { %s2834_s2 = scalar_lea.hbm %s2833_s0, 8  ;;  %p2840_p8 = scmp.lt.s32.totalorder %s2833_s0, %s3736_s3 }
  0x72   : > { %p2835_p1 = scmp.ne.s32.totalorder %s2833_s0, %s2834_s2  ;;  %p2841_p11 = scmp.lt.s32.totalorder %s2839_s23, %s2834_s2 }
  0x74   : > { %p2837_p5 = pnand %p2835_p1, %p2686_p10  ;;  %p2842_p13 = por %p2841_p11, %p2840_p8 }
  0x76   : > { %p2838_p6 = pneg %p2837_p5 }
  0x78   : > { %p2843_p0 = pnand %p2842_p13, %p2838_p6 }
  0x7a   : > { %2846 = shalt.err (!%p2843_p0)
}
  0x7b   : > { %2419 = dma.hbm_to_vmem [thread:$0]  (!%p3264_p9), %s777_s17, 128, %s779_s20, %s767_s10  }
  0x7c   : > { %s3738_s29 = sld [smem:[#allocation40_spill]] }
  0x7d   : > { %s3739_s16 = sld [smem:[#allocation41_spill]] }
  0x82   : > { %s813_s27 = scalar_lea.hbm %s3738_s29, %s2347_s8  ;;  %s2869_s10 = scalar_lea.hbm %s3738_s29, 32 }
  0x83   : > { %s835_s25 = scalar_lea.hbm %s3739_s16, %s2347_s8  ;;  %s814_s11 = sshll.u32 %s813_s27, 4  ;;  %s815_s11 = int_to_ptr.hbm [resolvable:$true] %s814_s11 }
  0x84   : > { %s836_s9 = sshll.u32 %s835_s25, 4  ;;  %s2862_s0 = sshra.s32 %s815_s11, 4  ;;  %s3357_s9 = int_to_ptr.hbm [resolvable:$true] %s836_s9  ;;  %s2863_s0 = int_to_ptr.hbm [resolvable:$true] %s2862_s0 }
  0x85   : > { %s2864_s2 = scalar_lea.hbm %s2863_s0, 16  ;;  %p2870_p6 = scmp.lt.s32.totalorder %s2863_s0, %s3738_s29 }
  0x86   : > { %p2865_p2 = scmp.ne.s32.totalorder %s2863_s0, %s2864_s2  ;;  %p2871_p8 = scmp.lt.s32.totalorder %s2869_s10, %s2864_s2 }
  0x88   : > { %p2867_p1 = pnand %p2865_p2, %p2686_p10  ;;  %p2872_p11 = por %p2871_p8, %p2870_p6 }
  0x8a   : > { %p2868_p5 = pneg %p2867_p1 }
  0x8c   : > { %p2873_p13 = pnand %p2872_p11, %p2868_p5 }
  0x8e   : > { %2876 = shalt.err (!%p2873_p13)
}
  0x8f   : > { %2425 = dma.hbm_to_vmem [thread:$0]  (!%p3264_p9), %s815_s11, 256, %s3295_s15, %s3278_s22, %s3732_s6, %s3732_s6, %s3731_s19  }
  0x90   : > { %s3740_s13 = sand.u32 1, %s3016_s28   ;;  %s2892_s5 = sshra.s32 %s3357_s9, 4  ;;  %s2893_s5 = int_to_ptr.hbm [resolvable:$true] %s2892_s5 }
  0x91   : > { %s827_s8 = scalar_lea.sflag [#allocation9], %s3740_s13  ;;  %s2894_s14 = scalar_lea.hbm %s2893_s5, 16 }
  0x92   : > { %p2895_p0 = scmp.ne.s32.totalorder %s2893_s5, %s2894_s14  ;;  %s2899_s27 = scalar_lea.hbm %s3739_s16, 32 }
  0x93   : > { %p2900_p5 = scmp.lt.s32.totalorder %s2893_s5, %s3739_s16  ;;  %p2901_p6 = scmp.lt.s32.totalorder %s2899_s27, %s2894_s14 }
  0x94   : > { %p2897_p2 = pnand %p2895_p0, %p2686_p10 }
  0x95   : > { %p2902_p8 = por %p2901_p6, %p2900_p5 }
  0x96   : > { %p2898_p1 = pneg %p2897_p2 }
  0x98   : > { %p2903_p11 = pnand %p2902_p8, %p2898_p1 }
  0x9a   : > { %2906 = shalt.err (!%p2903_p11)
}
  0x9b   : > { %2428 = dma.hbm_to_vmem [thread:$0]  (!%p3264_p9), %s3357_s9, 256, %s3297_s21, %s827_s8, %s3732_s6, %s3732_s6, %s3731_s19  }
  0x9c   : > { %850 = sbr.rel (%p3186_p3) target bundleno = 3833 (0xef9), region = 116  ;;  %s3397_s11 = sand.u32 (!%p3186_p3), 1, %s3008_s26  }
  0x9d   : > { %s3400_s15 = sshll.u32 (!%p3186_p3), %s3397_s11, 3  ;;  %s853_s22 = scalar_lea.sflag (!%p3186_p3), [#allocation3], %s3397_s11 }
  0x9e   : > { %s856_s24 = scalar_lea.vmem (!%p3186_p3), [#allocation2], %s3400_s15 }
  0xa1   : > { %2967 = dma.done.wait (%p3245_p12), %s853_s22, 128  }
  0xa2   : > { %2969 = vsyncadd (%p3245_p12), %s853_s22, 4294967168  ;;  %s862_s9 = sand.u32 1, %s3181_s7   ;;  %s866_s21 = scalar_lea.vmem [#allocation5], %s3400_s15 }
  0xa3   : > { %s863_s30 = scalar_lea.sflag [#allocation6], %s862_s9 }
  0xa4   : > { %2971 = dma.done.wait (%p3245_p12), %s863_s30, 384  }
  0xa5   : > { %2973 = vsyncadd (%p3245_p12), %s863_s30, 4294966912  ;;  %s2288_s19 = sshll.u32 %s3397_s11, 4  ;;  %s883_s2 = scalar_lea.sflag [#allocation9], %s862_s9 }
  0xa6   : > { %s3415_s6 = scalar_lea.vmem [#allocation7], %s2288_s19  ;;  %s3417_s17 = scalar_lea.vmem [#allocation8], %s2288_s19 }
  0xa7   : > { %2975 = dma.done.wait (%p3245_p12), %s883_s2, 256  }
  0xa8   : > { %2977 = vsyncadd (%p3245_p12), %s883_s2, 4294967040  ;;  %p3741_p3 = scmp.eq.s32.totalorder %s3181_s7, 0 }
  0xaa   : > { %2979 = dma.done.wait (%p3741_p3), [#allocation9], 512   ;;  %p3742_p9 = pmov %p3741_p3 }
  0xab   : > { %p3743_p10 = pmov %p3741_p3 }
  0xac   : > { %2981 = vsyncadd (%p3742_p9), [#allocation9], 4294966784 }
  0xad   : > { %2983 = dma.done.wait (%p3743_p10), [#allocation12], 1024   ;;  %p3744_p13 = pmov %p3741_p3 }
  0xae   : > { %p3745_p0 = pmov %p3741_p3 }
  0xaf   : > { %2985 = vsyncadd (%p3744_p13), [#allocation12], 4294966272 }
  0xb0   : > { %2987 = dma.done.wait (%p3745_p0), [#allocation15], 1024   ;;  %p3746_p2 = pmov %p3745_p0 }
  0xb1   : > { %p3747_p12 = pmov %p3745_p0 }
  0xb2   : > { %2989 = vsyncadd (%p3746_p2), [#allocation15], 4294966272 }
  0xb3   : > { %2991 = dma.done.wait (%p3747_p12), [#allocation18], 1024   ;;  %p3748_p1 = pmov %p3745_p0 }
  0xb4   : > { %p3749_p5 = pmov %p3745_p0 }
  0xb5   : > { %2993 = vsyncadd (%p3748_p1), [#allocation18], 4294966272 }
  0xb6   : > { %2995 = dma.done.wait (%p3749_p5), [#allocation21], 512   ;;  %p3750_p6 = pmov %p3745_p0 }
  0xb7   : > { %v1022_v0 = vld [vmem:[#allocation11 + $0x18] sm:$0xff]  ;;  %v1021_v2 = vld [vmem:[#allocation11 + $0x10] sm:$0xff]  ;;  %v1020_v4 = vld [vmem:[#allocation11 + $0x8] sm:$0xff]  ;;  %vm1039_vm0 = vcmask 261120   ;;  %s3751_s10 = sld [smem:[#allocation45_spill]]  ;;  %vm1117_vm1 = vcmask 64512  }
  0xb8   : > { %2997 = vsyncadd (%p3750_p6), [#allocation21], 4294966784  ;;  %v1017_v1 = vld [vmem:[#allocation10 + $0x18] sm:$0xff]  ;;  %1079 = vmatpush.msra.mxu1 %v1022_v0  ;;  %v1016_v3 = vld [vmem:[#allocation10 + $0x10] sm:$0xff]  ;;  %s3752_s13 = sld [smem:[#allocation43_spill]]  ;;  %s3028_s8 = smov 120  }
  0xb9   : > { %1055 = vmatpush.msra.mxu0 %v1017_v1  ;;  %v1015_v5 = vld [vmem:[#allocation10 + $0x8] sm:$0xff]  ;;  %v3447_v7 = vld [vmem:[%s866_s21] sm:$0xff]  ;;  %v1019_v10 = vld [vmem:[#allocation11] sm:$0xff]  ;;  %s3753_s18 = sld [smem:[#allocation47_spill]]  ;;  %s3029_s4 = smov 112   ;;  %vm1656_vm6 = vcmask 130048  }
  0xba   : > { %v3445_v6 = vld [vmem:[%s856_s24] sm:$0xff]  ;;  %1080 = vmatpush.msra.mxu1 %v1021_v2  ;;  %v1027_v8 = vld [vmem:[#allocation13 + $0x18] sm:$0xff]  ;;  %v1026_v9 = vld [vmem:[#allocation13 + $0x10] sm:$0xff]  ;;  %s3030_s27 = smov 104   ;;  %s3754_s22 = sld [smem:[#allocation49_spill]] }
  0xbb   : > { %1056 = vmatpush.msra.mxu0 %v1016_v3  ;;  %v1014_v11 = vld [vmem:[#allocation10] sm:$0xff]  ;;  %v1013_v12 = vadd.f32 %v3447_v7, %v3445_v6  ;;  %1105 = vmatpush.msra.mxu2 %v1027_v8  ;;  %v1025_v13 = vld [vmem:[#allocation13 + $0x8] sm:$0xff]  ;;  %s3755_s30 = sld [smem:[#allocation50_spill]]  ;;  %s2037_s20 = scalar_lea.sflag [#allocation4], %s3397_s11 }
  0xbc   : > { %1081 = vmatpush.msra.mxu1 %v1020_v4  ;;  %v1024_v14 = vld [vmem:[#allocation13] sm:$0xff]  ;;  %v1030_v47 = vld [vmem:[#allocation14 + $0x8] sm:$0xff]  ;;  %s3757_s1 = sld [smem:[#allocation55_spill]] }
  0xbd   : > { %1057 = vmatpush.msra.mxu0 %v1015_v5  ;;  %1106 = vmatpush.msra.mxu2 %v1026_v9  ;;  %v2512_v15 = vld [vmem:[%s3751_s10] ss:$0 sm:$0xff]  ;;  %s3758_s23 = sld [smem:[#allocation57_spill]] }
  0xbe   : > { %1082 = vmatpush.msra.mxu1 %v1019_v10  ;;  %v2513_v16 = vld [vmem:[%s3752_s13] ss:$0 sm:$0xff]  ;;  %s3759_s5 = sld [smem:[#allocation53_spill]] }
  0xbf   : > { %1058 = vmatpush.msra.mxu0 %v1014_v11  ;;  %2300 = vmatmul.msk.f32.vlgmr.msra.gmra.mxu1 %vm1039_vm0, %v1013_v12  ;;  %v2514_v22 = vld [vmem:[%s3753_s18] ss:$0 sm:$0xff]  ;;  %s3760_s18 = sld [smem:[#allocation59_spill]] }
  0xc0   : > { %2299 = vmatmul.msk.f32.vlgmr.msra.gmra.mxu0 %vm1039_vm0, %v1013_v12  ;;  %1107 = vmatpush.msra.mxu2 %v1025_v13  ;;  %v1029_v37 = vld [vmem:[#allocation14] sm:$0xff]  ;;  %s3761_s0 = sld [smem:[#allocation60_spill]] }
  0xc1   : > { %1196 = vmatpush.msrb.mxu0 %v1029_v37  ;;  %v2515_v59 = vld [vmem:[%s3754_s22] ss:$0 sm:$0xff]  ;;  %s3762_s9 = sld [smem:[#allocation62_spill]] }
  0xc2   : > { %1108 = vmatpush.msra.mxu2 %v1024_v14  ;;  %v1116_v60 = vadd.f32 %v2515_v59, %v3445_v6  ;;  %s3764_s2 = sld [smem:[#allocation61_spill]] }
  0xc3   : > { %2301 = vmatmul.msk.f32.vlgmr.msra.gmra.mxu2 %vm1039_vm0, %v3445_v6 }
 0x13c   : > { %v1084_v17 = vpop.f32.mrf.mxu1 }
 0x13d   : > { %v1060_v18 = vpop.f32.mrf.mxu0  ;;  %v1085_v19 = vadd.f32 %v2512_v15, %v1084_v17 }
 0x13e   : > { %v1061_v20 = vadd.f32 %v2513_v16, %v1060_v18  ;;  %v1031_v18 = vld [vmem:[#allocation14 + $0x10] sm:$0xff] }
 0x13f   : > { %1204 = vrot.lane.b32.xlu0 %v1085_v19, %s3028_s8  ;;  %2302 = vmatpush.xpose.msk.msra.mxu3 %vm1117_vm1, %v1085_v19 }
 0x140   : > { %v1063_v21 = vmul.f32 0.35355338, %v1061_v20 }
 0x142   : > { %2303 = vmatmul.msk.f32.vlgmr.msra.gmra.mxu3 %vm1117_vm1, %v1063_v21 }
 0x146   : > { %v1110_v23 = vpop.f32.mrf.mxu2 }
 0x147   : > { %1202 = vrot.lane.b32.xlu0 %v1063_v21, %s3028_s8  ;;  %v3468_v24 = vadd.f32 %v2514_v22, %v1110_v23 }
 0x149   : > { %1173 = vmatpush.msrb.mxu3 %v3468_v24 }
 0x14b   : > { %1286 = vmatpush.msra.mxu3 %v1030_v47  ;;  %v1515_v47 = vld [vmem:[#allocation17] sm:$0xff] }
 0x14f   : > { %1242 = vrot.lane.b32.xlu0 %v3468_v24, %s3028_s8 }
 0x157   : > { %1292 = vrot.lane.b32.xlu0 %v1063_v21, %s3029_s4 }
 0x15f   : > { %1381 = vrot.lane.b32.xlu0 %v1063_v21, %s3030_s27 }
 0x1b1   : > { %v1205_v25 = vpop.permute.xlu0 %1204 }
 0x1b2   : > { %2306 = vmatpush.xpose.msk.msrb.mxu1 %vm1117_vm1, %v1205_v25 }
 0x1b9   : > { %v1203_v26 = vpop.permute.xlu0 %1202 }
 0x1ba   : > { %2307 = vmatmul.msk.f32.vlgmr.msrb.gmra.mxu1 %vm1117_vm1, %v1203_v26 }
 0x1c1   : > { %v1243_v27 = vpop.permute.xlu0 %1242 }
 0x1c2   : > { %1263 = vmatpush.msrb.mxu2 %v1243_v27 }
 0x1c4   : > { %1375 = vmatpush.msra.mxu2 %v1031_v18  ;;  %v2520_v18 = vld [vmem:[%s3758_s23] ss:$0 sm:$0xff] }
 0x1c5   : > { %v1141_v28 = vpop.f32.mrf.mxu3 }
 0x1c6   : > { %v1144_v29 = vsel %vm1117_vm1, %v1141_v28, -inf }
 0x1c7   : > { %1145 = vmax.xlane.f32.xlu1 %v1144_v29 }
 0x1c9   : > { %v1293_v53 = vpop.permute.xlu0 %1292 }
 0x1d1   : > { %v1382_v55 = vpop.permute.xlu0 %1381 }
 0x237   : > { %v1227_v30 = vpop.f32.mrf.mxu1 }
 0x238   : > { %v1230_v31 = vsel %vm1117_vm1, %v1227_v30, -inf }
 0x239   : > { %1231 = vmax.xlane.f32.xlu1 %v1230_v31  ;;  %v1518_v31 = vld [vmem:[#allocation17 + $0x18] sm:$0xff] }
 0x23a   : > { %v1146_v32 = vpop.xlane.xlu1 %1145 }
 0x23b   : > { %v1147_v33 = vsub.f32 %v1141_v28, %v1146_v32  ;;  %v1517_v32 = vld [vmem:[#allocation17 + $0x10] sm:$0xff] }
 0x23d   : > { %v1148_v34 = vmul.f32 1.442695, %v1147_v33 }
 0x23f   : > { %2524 = vpow2.f32 %v1148_v34 }
 0x245   : > { %v2525_v35 = vpop.eup %2524 }
 0x246   : > { %v1150_v36 = vsel %vm1117_vm1, %v2525_v35, 0.0 }
 0x247   : > { %1151 = vadd.xlane.f32.xlu2 %v1150_v36 }
 0x252   : > { %1294 = vrot.lane.b32.xlu1 %v1085_v19, %s3029_s4 }
 0x2ac   : > { %v1232_v38 = vpop.xlane.xlu1 %1231 }
 0x2ad   : > { %v1233_v39 = vsub.f32 %v1227_v30, %v1232_v38  ;;  %v3031_v30 = vmov 32.0  }
 0x2af   : > { %v1234_v40 = vmul.f32 1.442695, %v1233_v39 }
 0x2b1   : > { %2526 = vpow2.f32 %v1234_v40 }
 0x2b7   : > { %v2527_v41 = vpop.eup %2526 }
 0x2b8   : > { %v1236_v42 = vsel %vm1117_vm1, %v2527_v41, 0.0 }
 0x2b9   : > { %1237 = vadd.xlane.f32.xlu2 %v1236_v42 }
 0x2ba   : > { %v1152_v43 = vpop.xlane.xlu2 %1151 }
 0x2bb   : > { %2528 = vrcp.f32 %v1152_v43 }
 0x2c1   : > { %v2529_v44 = vpop.eup %2528 }
 0x2c2   : > { %v1154_v45 = vmul.f32 %v2529_v44, %v2525_v35  ;;  %v1516_v44 = vld [vmem:[#allocation17 + $0x8] sm:$0xff] }
 0x2c4   : > { %2304 = vmatmul.msk.f32.vlgmr.msrb.gmra.mxu3 %vm1117_vm1, %v1154_v45  ;;  %v1295_v46 = vpop.permute.xlu1 %1294  ;;  %v1009_v45 = vld [vmem:[%s3415_s6] sm:$0xff] }
 0x2c5   : > { %2310 = vmatpush.xpose.msk.msra.mxu0 %vm1117_vm1, %v1295_v46  ;;  %v1011_v46 = vld [vmem:[%s3417_s17] sm:$0xff] }
 0x2d1   : > { %1383 = vrot.lane.b32.xlu2 %v1085_v19, %s3030_s27  ;;  %v1032_v19 = vld [vmem:[#allocation14 + $0x18] sm:$0xff] }
 0x32c   : > { %v1238_v48 = vpop.xlane.xlu2 %1237 }
 0x32d   : > { %2530 = vrcp.f32 %v1238_v48  ;;  %v1508_v48 = vadd.f32 %v1011_v46, %v1009_v45 }
 0x333   : > { %v2531_v49 = vpop.eup %2530 }
 0x334   : > { %v1384_v50 = vpop.permute.xlu2 %1383  ;;  %v1240_v51 = vmul.f32 %v2531_v49, %v2527_v41  ;;  %v1010_v49 = vld [vmem:[%s3415_s6 + $0x8] sm:$0xff]  ;;  %s3756_s6 = sld [smem:[#allocation51_spill]] }
 0x335   : > { %2314 = vmatpush.xpose.msk.msrb.mxu3 %vm1117_vm1, %v1384_v50  ;;  %v1012_v50 = vld [vmem:[%s3417_s17 + $0x8] sm:$0xff] }
 0x336   : > { %2308 = vmatmul.msk.f32.vlgmr.msrb.gmra.mxu2 %vm1117_vm1, %v1240_v51  ;;  %v1509_v51 = vadd.f32 %v1012_v50, %v1010_v49 }
 0x347   : > { %v1175_v52 = vpop.f32.mrf.mxu3 }
 0x348   : > { %2305 = vmatmul.msk.f32.vlgmr.msrb.gmra.mxu0 %vm1117_vm1, %v1175_v52  ;;  %v1513_v52 = vld [vmem:[#allocation16 + $0x18] sm:$0xff] }
 0x349   : > { %1550 = vmatpush.msrb.mxu2 %v1513_v52 }
 0x350   : > { %2311 = vmatmul.msk.f32.vlgmr.msra.gmra.mxu0 %vm1117_vm1, %v1293_v53  ;;  %v1512_v53 = vld [vmem:[#allocation16 + $0x10] sm:$0xff] }
 0x351   : > { %1551 = vmatpush.msrb.mxu2 %v1512_v53 }
 0x3b9   : > { %v1265_v54 = vpop.f32.mrf.mxu2 }
 0x3ba   : > { %2309 = vmatmul.msk.f32.vlgmr.msra.gmra.mxu3 %vm1117_vm1, %v1265_v54  ;;  %v1511_v54 = vld [vmem:[#allocation16 + $0x8] sm:$0xff] }
 0x3bb   : > { %1580 = vmatpush.msra.mxu3 %v1518_v31  ;;  %1552 = vmatpush.msrb.mxu2 %v1511_v54 }
 0x3bd   : > { %1581 = vmatpush.msra.mxu3 %v1517_v32 }
 0x3bf   : > { %1582 = vmatpush.msra.mxu3 %v1516_v44 }
 0x3c1   : > { %1583 = vmatpush.msra.mxu3 %v1515_v47 }
 0x3c2   : > { %2315 = vmatmul.msk.f32.vlgmr.msrb.gmra.mxu3 %vm1117_vm1, %v1382_v55  ;;  %v1510_v55 = vld [vmem:[#allocation16] sm:$0xff] }
 0x3c3   : > { %1553 = vmatpush.msrb.mxu2 %v1510_v55 }
 0x3c5   : > { %v1198_v56 = vpop.f32.mrf.mxu0 }
 0x3c6   : > { %v1201_v61 = vadd.f32 %v1198_v56, %v1116_v60  ;;  %v1523_v56 = vld [vmem:[#allocation19 + $0x18] sm:$0xff]  ;;  %v1521_v60 = vld [vmem:[#allocation19 + $0x8] sm:$0xff] }
 0x3ca   : > { %2319 = vmatmul.msk.f32.vlgmr.msra.gmra.mxu3 %vm1039_vm0, %v1508_v48 }
 0x3cd   : > { %v1317_v57 = vpop.f32.mrf.mxu0 }
 0x3ce   : > { %v1320_v58 = vsel %vm1117_vm1, %v1317_v57, -inf }
 0x3cf   : > { %1321 = vmax.xlane.f32.xlu0 %v1320_v58 }
 0x3d2   : > { %2320 = vmatmul.msk.f32.gmra.mxu3 %vm1039_vm0, %v1509_v51 }
 0x3e3   : > { %1331 = vrot.lane.b32.xlu0 %v3468_v24, %s3029_s4 }
 0x43d   : > { %v1288_v62 = vpop.f32.mrf.mxu3 }
 0x43e   : > { %v1291_v63 = vadd.f32 %v1288_v62, %v1201_v61  ;;  %v1520_v62 = vld [vmem:[#allocation19] sm:$0xff] }
 0x442   : > { %v1322_v0 = vpop.xlane.xlu0 %1321 }
 0x443   : > { %v1323_v1 = vsub.f32 %v1317_v57, %v1322_v0  ;;  %v1522_v57 = vld [vmem:[#allocation19 + $0x10] sm:$0xff] }
 0x445   : > { %v1324_v2 = vmul.f32 1.442695, %v1323_v1  ;;  %v1406_v3 = vpop.f32.mrf.mxu3 }
 0x446   : > { %v1409_v4 = vsel %vm1117_vm1, %v1406_v3, -inf }
 0x447   : > { %2532 = vpow2.f32 %v1324_v2  ;;  %1410 = vmax.xlane.f32.xlu2 %v1409_v4 }
 0x44d   : > { %v2533_v5 = vpop.eup %2532 }
 0x44e   : > { %v1326_v8 = vsel %vm1117_vm1, %v2533_v5, 0.0 }
 0x44f   : > { %1327 = vadd.xlane.f32.xlu1 %v1326_v8 }
 0x455   : > { %v1332_v9 = vpop.permute.xlu0 %1331 }
 0x456   : > { %1352 = vmatpush.msra.mxu1 %v1332_v9  ;;  %v2517_v9 = vld [vmem:[%s3756_s6] ss:$0 sm:$0xff] }
 0x458   : > { %1464 = vmatpush.msrb.mxu1 %v1032_v19 }
 0x468   : > { %1420 = vrot.lane.b32.xlu1 %v3468_v24, %s3030_s27 }
 0x4ba   : > { %v1411_v6 = vpop.xlane.xlu2 %1410 }
 0x4bb   : > { %v1412_v10 = vsub.f32 %v1406_v3, %v1411_v6 }
 0x4bd   : > { %v1413_v11 = vmul.f32 1.442695, %v1412_v10 }
 0x4bf   : > { %2534 = vpow2.f32 %v1413_v11 }
 0x4c2   : > { %v1328_v12 = vpop.xlane.xlu1 %1327 }
 0x4c3   : > { %2536 = vrcp.f32 %v1328_v12 }
 0x4c5   : > { %v2535_v13 = vpop.eup %2534 }
 0x4c6   : > { %v1415_v14 = vsel %vm1117_vm1, %v2535_v13, 0.0 }
 0x4c7   : > { %1416 = vadd.xlane.f32.xlu2 %v1415_v14  ;;  %v2518_v14 = vld [vmem:[%s3757_s1] ss:$0 sm:$0xff] }
 0x4c9   : > { %v2537_v15 = vpop.eup %2536 }
 0x4ca   : > { %v1330_v16 = vmul.f32 %v2537_v15, %v2533_v5  ;;  %v2516_v5 = vld [vmem:[%s3755_s30] ss:$0 sm:$0xff] }
 0x4cc   : > { %2312 = vmatmul.msk.f32.vlgmr.msra.gmra.mxu1 %vm1117_vm1, %v1330_v16 }
 0x4da   : > { %v1421_v17 = vpop.permute.xlu1 %1420 }
 0x4db   : > { %1441 = vmatpush.msrb.mxu0 %v1421_v17 }
 0x4dd   : > { %1612 = vmatpush.msra.mxu0 %v1523_v56  ;;  %v1526_v56 = vld [vmem:[#allocation20 + $0x8] sm:$0xff] }
 0x4df   : > { %1613 = vmatpush.msra.mxu0 %v1522_v57 }
 0x4e1   : > { %1614 = vmatpush.msra.mxu0 %v1521_v60 }
 0x4e3   : > { %1615 = vmatpush.msra.mxu0 %v1520_v62 }
 0x53a   : > { %v1417_v20 = vpop.xlane.xlu2 %1416 }
 0x53b   : > { %2538 = vrcp.f32 %v1417_v20 }
 0x53c   : > { %2540 = vrcp.f32 %v3031_v30  ;;  %v1525_v30 = vld [vmem:[#allocation20] sm:$0xff] }
 0x541   : > { %v2539_v21 = vpop.eup %2538 }
 0x542   : > { %v1419_v22 = vmul.f32 %v2539_v21, %v2535_v13  ;;  %v2541_v33 = vpop.eup %2540  ;;  %v1585_v13 = vpop.f32.mrf.mxu3 }
 0x543   : > { %v1474_v34 = vmul.f32 32.0, %v2541_v33  ;;  %vm1478_vm2 = vweird.f32 %v2541_v33  ;;  %v1586_v17 = vadd.f32 %v2518_v14, %v1585_v13  ;;  %v2521_v13 = vld [vmem:[%s3760_s18] ss:$0 sm:$0xff] }
 0x544   : > { %2316 = vmatmul.msk.f32.vlgmr.msrb.gmra.mxu0 %vm1117_vm1, %v1419_v22  ;;  %v2519_v22 = vld [vmem:[%s3759_s5] ss:$0 sm:$0xff] }
 0x545   : > { %v1475_v35 = vsub.f32 1.0, %v1474_v34  ;;  %1807 = vmatpush.msrb.mxu0 %v1526_v56  ;;  %v2522_v56 = vld [vmem:[%s3761_s0] ss:$0 sm:$0xff] }
 0x547   : > { %v1476_v36 = vmul.f32 %v2541_v33, %v1475_v35 }
 0x549   : > { %v1354_v23 = vpop.f32.mrf.mxu1  ;;  %v1477_v37 = vadd.f32 %v2541_v33, %v1476_v36 }
 0x54a   : > { %2313 = vmatmul.msk.f32.vlgmr.msra.gmra.mxu2 %vm1117_vm1, %v1354_v23  ;;  %v1588_v15 = vpop.f32.mrf.mxu3 }
 0x54b   : > { %v3508_v38 = vsel %vm1478_vm2, %v2541_v33, %v1477_v37  ;;  %v3535_v16 = vadd.f32 %v2518_v14, %v1588_v15 }
 0x54c   : > { %2321 = vmatmul.msk.f32.vlgmr.msra.gmra.mxu0 %vm1039_vm0, %v1009_v45 }
 0x54d   : > { %2323 = vmatpush.xpose.msk.msra.mxu1 %vm1117_vm1, %v3535_v16  ;;  %1719 = vrot.lane.b32.xlu1 %v3535_v16, %s3028_s8 }
 0x551   : > { %2324 = vmatpush.xpose.msk.msra.mxu1 %vm1117_vm1, %v1586_v17 }
 0x554   : > { %2322 = vmatmul.msk.f32.gmra.mxu0 %vm1039_vm0, %v1010_v49 }
 0x5c1   : > { %v1443_v24 = vpop.f32.mrf.mxu0 }
 0x5c2   : > { %2317 = vmatmul.msk.f32.vlgmr.msrb.gmra.mxu1 %vm1117_vm1, %v1443_v24 }
 0x5c3   : > { %1709 = vmatpush.msrb.mxu1 %v1525_v30 }
 0x5cd   : > { %v1377_v25 = vpop.f32.mrf.mxu2 }
 0x5ce   : > { %v1380_v26 = vadd.f32 %v1377_v25, %v1291_v63 }
 0x63f   : > { %v1466_v27 = vpop.f32.mrf.mxu1 }
 0x640   : > { %v1469_v28 = vadd.f32 %v1466_v27, %v1380_v26  ;;  %v1720_v26 = vpop.permute.xlu1 %1719 }
 0x642   : > { %v1470_v29 = vsel %vm1039_vm0, %v1469_v28, 0.0 }
 0x643   : > { %1471 = vadd.xlane.f32.xlu2 %v1470_v29 }
 0x6b6   : > { %v1472_v39 = vpop.xlane.xlu2 %1471 }
 0x6b7   : > { %v1480_v40 = vmul.f32 %v3508_v38, %v1472_v39 }
 0x6b9   : > { %v1481_v41 = vsub.f32 %v1469_v28, %v1480_v40 }
 0x6bb   : > { %v1482_v42 = vmul.f32 %v1481_v41, %v1481_v41 }
 0x6bd   : > { %v1483_v43 = vsel %vm1039_vm0, %v1482_v42, 0.0 }
 0x6be   : > { %1484 = vadd.xlane.f32.xlu2 %v1483_v43 }
 0x731   : > { %v1485_v58 = vpop.xlane.xlu2 %1484 }
 0x732   : > { %v1486_v59 = vmul.f32 %v1485_v58, %v3508_v38 }
 0x734   : > { %v1487_v61 = vadd.f32 1e-05, %v1486_v59 }
 0x736   : > { %2542 = vrsqrt.f32 %v1487_v61  ;;  %vm1494_vm4 = vweird.f32 %v1487_v61 }
 0x73c   : > { %v2543_v63 = vpop.eup %2542 }
 0x73d   : > { %v1489_v0 = vmul.f32 %v2543_v63, %v1487_v61  ;;  %vm1495_vm3 = vweird.f32 %v2543_v63 }
 0x73e   : > { %vm1496_vm5 = vmor %vm1494_vm4, %vm1495_vm3 }
 0x73f   : > { %v1490_v1 = vmul.f32 %v2543_v63, %v1489_v0 }
 0x741   : > { %v1491_v2 = vmul.f32 0.5, %v1490_v1 }
 0x743   : > { %v1492_v3 = vsub.f32 1.5, %v1491_v2 }
 0x745   : > { %v1493_v4 = vmul.f32 %v2543_v63, %v1492_v3 }
 0x747   : > { %v1497_v8 = vsel %vm1496_vm5, %v2543_v63, %v1493_v4 }
 0x748   : > { %v1498_v6 = vmul.f32 %v1497_v8, %v1481_v41 }
 0x74a   : > { %v1502_v10 = vmul.f32 %v2516_v5, %v1498_v6 }
 0x74c   : > { %v3527_v11 = vadd.f32 %v2517_v9, %v1502_v10 }
 0x74e   : > { %v1507_v12 = vadd.f32 %v3527_v11, %v3447_v7  ;;  %v1617_v7 = vpop.f32.mrf.mxu0  ;;  %v1626_v14 = vadd.f32 %v2521_v13, %v3527_v11 }
 0x74f   : > { %v1618_v20 = vadd.f32 %v2520_v18, %v1617_v7 }
 0x750   : > { %2318 = vmatmul.msk.f32.vlgmr.msrb.gmra.mxu2 %vm1039_vm0, %v1507_v12 }
 0x756   : > { %v1620_v19 = vpop.f32.mrf.mxu0 }
 0x757   : > { %v1621_v21 = vadd.f32 %v2520_v18, %v1620_v19 }
 0x759   : > { %1685 = vmatpush.msra.mxu2 %v1621_v21  ;;  %v3552_v29 = vpack.i.bf16 %v1618_v20, %v1621_v21 }
 0x75b   : > { %1686 = vmatpush.msra.mxu2 %v1618_v20 }
 0x75d   : > { %2328 = vmatpush.xpose.msk.msrb.mxu2 %vm1117_vm1, %v1720_v26 }
 0x7d3   : > { %v1555_v23 = vpop.f32.mrf.mxu2 }
 0x7d4   : > { %v1556_v24 = vadd.f32 %v2519_v22, %v1555_v23 }
 0x7d6   : > { %v1558_v25 = vmul.f32 0.35355338, %v1556_v24 }
 0x7d8   : > { %1715 = vrot.lane.b32.xlu1 %v1558_v25, %s3028_s8  ;;  %2325 = vmatmul.msk.f32.vlgmr.msra.gmra.mxu1 %vm1117_vm1, %v1558_v25 }
 0x84a   : > { %v1716_v45 = vpop.permute.xlu1 %1715 }
 0x855   : > { %v1653_v27 = vpop.f32.mrf.mxu1 }
 0x856   : > { %v1657_v28 = vsel %vm1656_vm6, %v1653_v27, -inf }
 0x857   : > { %1658 = vmax.xlane.f32.xlu0 %v1657_v28 }
 0x86b   : > { %2498 = vrot.lane.b32.xlu0 %v3552_v29, %s3028_s8 }
 0x873   : > { %1817 = vrot.lane.b32.xlu0 %v3535_v16, %s3029_s4 }
 0x87b   : > { %1813 = vrot.lane.b32.xlu0 %v1558_v25, %s3029_s4 }
 0x883   : > { %1911 = vrot.lane.b32.xlu0 %v1586_v17, %s3030_s27 }
 0x88b   : > { %1909 = vrot.lane.b32.xlu0 %v1558_v25, %s3030_s27  ;;  %v1527_v25 = vld [vmem:[#allocation20 + $0x10] sm:$0xff] }
 0x8ca   : > { %v1659_v31 = vpop.xlane.xlu0 %1658 }
 0x8cb   : > { %v1660_v32 = vsub.f32 %v1653_v27, %v1659_v31  ;;  %v1528_v31 = vld [vmem:[#allocation20 + $0x18] sm:$0xff] }
 0x8cd   : > { %v1661_v33 = vmul.f32 1.442695, %v1660_v32 }
 0x8cf   : > { %2544 = vpow2.f32 %v1661_v33 }
 0x8d5   : > { %v2545_v34 = vpop.eup %2544 }
 0x8d6   : > { %v1663_v35 = vsel %vm1656_vm6, %v2545_v34, 0.0 }
 0x8d7   : > { %1664 = vadd.xlane.f32.xlu2 %v1663_v35 }
 0x8dd   : > { %v2499_v36 = vpop.permute.xlu0 %2498 }
 0x8de   : > { %v2501_v37 = vunpack.i.h.bf16 %v2499_v36  ;;  %v2500_v39 = vunpack.i.l.bf16 %v2499_v36 }
 0x8e0   : > { %1783 = vmatpush.msrb.mxu3 %v2500_v39 }
 0x8e2   : > { %1784 = vmatpush.msrb.mxu3 %v2501_v37 }
 0x8e4   : > { %1903 = vmatpush.msra.mxu3 %v1527_v25 }
 0x8e5   : > { %v1818_v40 = vpop.permute.xlu0 %1817 }
 0x8e6   : > { %2333 = vmatpush.xpose.msk.msra.mxu1 %vm1117_vm1, %v1818_v40 }
 0x8ed   : > { %v1814_v55 = vpop.permute.xlu0 %1813 }
 0x8ef   : > { %1717 = vrot.lane.b32.xlu2 %v1586_v17, %s3028_s8 }
 0x8f5   : > { %v1912_v61 = vpop.permute.xlu0 %1911 }
 0x8fd   : > { %v1910_v5 = vpop.permute.xlu0 %1909 }
 0x94a   : > { %v1665_v41 = vpop.xlane.xlu2 %1664 }
 0x94b   : > { %2546 = vrcp.f32 %v1665_v41 }
 0x951   : > { %v2547_v42 = vpop.eup %2546 }
 0x952   : > { %v1667_v43 = vmul.f32 %v2547_v42, %v2545_v34  ;;  %v1718_v44 = vpop.permute.xlu2 %1717 }
 0x953   : > { %2329 = vmatpush.xpose.msk.msrb.mxu2 %vm1117_vm1, %v1718_v44 }
 0x954   : > { %2326 = vmatmul.msk.f32.vlgmr.msra.gmra.mxu2 %vm1656_vm6, %v1667_v43 }
 0x95c   : > { %2330 = vmatmul.msk.f32.vlgmr.msrb.gmra.mxu2 %vm1117_vm1, %v1716_v45 }
 0x9d7   : > { %v1688_v46 = vpop.f32.mrf.mxu2 }
 0x9d8   : > { %2327 = vmatmul.msk.f32.vlgmr.msrb.gmra.mxu1 %vm1117_vm1, %v1688_v46 }
 0x9df   : > { %v1744_v47 = vpop.f32.mrf.mxu2 }
 0x9e0   : > { %v1747_v48 = vsel %vm1656_vm6, %v1744_v47, -inf }
 0x9e1   : > { %1748 = vmax.xlane.f32.xlu1 %v1747_v48 }
 0x9fa   : > { %1815 = vrot.lane.b32.xlu1 %v1586_v17, %s3029_s4 }
 0xa54   : > { %v1749_v49 = vpop.xlane.xlu1 %1748 }
 0xa55   : > { %v1750_v50 = vsub.f32 %v1744_v47, %v1749_v49  ;;  %v1711_v62 = vpop.f32.mrf.mxu1 }
 0xa56   : > { %v1714_v15 = vadd.f32 %v1711_v62, %v1626_v14 }
 0xa57   : > { %v1751_v51 = vmul.f32 1.442695, %v1750_v50 }
 0xa59   : > { %2548 = vpow2.f32 %v1751_v51 }
 0xa5f   : > { %v2549_v52 = vpop.eup %2548 }
 0xa60   : > { %v1753_v53 = vsel %vm1656_vm6, %v2549_v52, 0.0 }
 0xa61   : > { %1754 = vadd.xlane.f32.xlu2 %v1753_v53 }
 0xa6c   : > { %v1816_v54 = vpop.permute.xlu1 %1815 }
 0xa6d   : > { %2334 = vmatpush.xpose.msk.msra.mxu1 %vm1117_vm1, %v1816_v54 }
 0xa70   : > { %2335 = vmatmul.msk.f32.vlgmr.msra.gmra.mxu1 %vm1117_vm1, %v1814_v55 }
 0xa79   : > { %1913 = vrot.lane.b32.xlu2 %v3535_v16, %s3030_s27 }
 0xad4   : > { %v1755_v57 = vpop.xlane.xlu2 %1754 }
 0xad5   : > { %2550 = vrcp.f32 %v1755_v57 }
 0xadb   : > { %v2551_v58 = vpop.eup %2550 }
 0xadc   : > { %v1757_v59 = vmul.f32 %v2551_v58, %v2549_v52  ;;  %v1914_v60 = vpop.permute.xlu2 %1913  ;;  %v2523_v58 = vld [vmem:[%s3764_s2] ss:$0 sm:$0xff] }
 0xadd   : > { %2338 = vmatpush.xpose.msk.msra.mxu0 %vm1117_vm1, %v1914_v60 }
 0xade   : > { %2331 = vmatmul.msk.f32.vlgmr.msrb.gmra.mxu3 %vm1656_vm6, %v1757_v59 }
 0xae1   : > { %2339 = vmatpush.xpose.msk.msra.mxu0 %vm1117_vm1, %v1912_v61 }
 0xaed   : > { %v1842_v63 = vpop.f32.mrf.mxu1 }
 0xaee   : > { %v1845_v0 = vsel %vm1656_vm6, %v1842_v63, -inf }
 0xaef   : > { %1846 = vmax.xlane.f32.xlu1 %v1845_v0 }
 0xb08   : > { %2503 = vrot.lane.b32.xlu1 %v3552_v29, %s3029_s4  ;;  %s2344_s4 = sshll.u32 %s3181_s7, 3  ;;  %s1006_s7 = scalar_lea.vmem [#allocation22], %s3400_s15 }
 0xb09   : > { %s2047_s30 = scalar_lea.hbm %s3762_s9, %s2344_s4  ;;  %s2049_s17 = sshll.u32 %s1006_s7, 4  ;;  %s2050_s17 = int_to_ptr.vmem [resolvable:$true] %s2049_s17 }
 0xb0a   : > { %s2051_s1 = sshll.u32 %s2047_s30, 4  ;;  %s2942_s15 = scalar_lea.hbm %s3762_s9, 16  ;;  %s2052_s1 = int_to_ptr.hbm [resolvable:$true] %s2051_s1 }
 0xb0b   : > { %s2936_s10 = sshra.s32 %s2052_s1, 4  ;;  %s2937_s10 = int_to_ptr.hbm [resolvable:$true] %s2936_s10 }
 0xb0c   : > { %s2938_s23 = scalar_lea.hbm %s2937_s10, 8  ;;  %p2943_p9 = scmp.lt.s32.totalorder %s2937_s10, %s3762_s9 }
 0xb0d   : > { %p2939_p8 = scmp.ne.s32.totalorder %s2937_s10, %s2938_s23  ;;  %p2944_p10 = scmp.lt.s32.totalorder %s2942_s15, %s2938_s23 }
 0xb0f   : > { %p2940_p11 = pnand %p2939_p8, %p3254_p4  ;;  %p2945_p13 = por %p2944_p10, %p2943_p9 }
 0xb11   : > { %p2941_p3 = pneg %p2940_p11 }
 0xb13   : > { %p2946_p0 = pnand %p2945_p13, %p2941_p3 }
 0xb61   : > { %v1786_v1 = vpop.f32.mrf.mxu3 }
 0xb62   : > { %v1847_v2 = vpop.xlane.xlu1 %1846  ;;  %2332 = vmatmul.msk.f32.vlgmr.msrb.gmra.mxu0 %vm1117_vm1, %v1786_v1 }
 0xb63   : > { %v1848_v3 = vsub.f32 %v1842_v63, %v1847_v2 }
 0xb65   : > { %v1849_v4 = vmul.f32 1.442695, %v1848_v3 }
 0xb67   : > { %2552 = vpow2.f32 %v1849_v4 }
 0xb6a   : > { %2340 = vmatmul.msk.f32.vlgmr.msra.gmra.mxu0 %vm1117_vm1, %v1910_v5 }
 0xb6d   : > { %v2553_v8 = vpop.eup %2552 }
 0xb6e   : > { %v1851_v9 = vsel %vm1656_vm6, %v2553_v8, 0.0 }
 0xb6f   : > { %1852 = vadd.xlane.f32.xlu2 %v1851_v9 }
 0xb7a   : > { %v2504_v6 = vpop.permute.xlu1 %2503 }
 0xb7b   : > { %v2505_v10 = vunpack.i.l.bf16 %v2504_v6  ;;  %v2506_v12 = vunpack.i.h.bf16 %v2504_v6 }
 0xb7d   : > { %1879 = vmatpush.msra.mxu2 %v2505_v10 }
 0xb7f   : > { %1880 = vmatpush.msra.mxu2 %v2506_v12 }
 0xb81   : > { %1999 = vmatpush.msrb.mxu2 %v1528_v31 }
 0xb87   : > { %2508 = vrot.lane.b32.xlu2 %v3552_v29, %s3030_s27 }
 0xbdf   : > { %v1809_v16 = vpop.f32.mrf.mxu0 }
 0xbe0   : > { %v1812_v17 = vadd.f32 %v1809_v16, %v1714_v15 }
 0xbe2   : > { %v1853_v7 = vpop.xlane.xlu2 %1852 }
 0xbe3   : > { %2554 = vrcp.f32 %v1853_v7 }
 0xbe7   : > { %v1938_v18 = vpop.f32.mrf.mxu0 }
 0xbe8   : > { %v1941_v19 = vsel %vm1656_vm6, %v1938_v18, -inf }
 0xbe9   : > { %v2555_v20 = vpop.eup %2554  ;;  %1942 = vmax.xlane.f32.xlu0 %v1941_v19 }
 0xbea   : > { %v1855_v21 = vmul.f32 %v2555_v20, %v2553_v8  ;;  %v2509_v22 = vpop.permute.xlu2 %2508 }
 0xbeb   : > { %v2510_v23 = vunpack.i.l.bf16 %v2509_v22  ;;  %v2511_v24 = vunpack.i.h.bf16 %v2509_v22 }
 0xbec   : > { %2336 = vmatmul.msk.f32.vlgmr.msra.gmra.mxu2 %vm1656_vm6, %v1855_v21 }
 0xbed   : > { %1975 = vmatpush.msrb.mxu1 %v2510_v23 }
 0xbef   : > { %1976 = vmatpush.msrb.mxu1 %v2511_v24 }
 0xc5c   : > { %v1943_v11 = vpop.xlane.xlu0 %1942 }
 0xc5d   : > { %v1944_v26 = vsub.f32 %v1938_v18, %v1943_v11 }
 0xc5f   : > { %v1945_v27 = vmul.f32 1.442695, %v1944_v26 }
 0xc61   : > { %2556 = vpow2.f32 %v1945_v27 }
 0xc67   : > { %v2557_v28 = vpop.eup %2556 }
 0xc68   : > { %v1947_v29 = vsel %vm1656_vm6, %v2557_v28, 0.0 }
 0xc69   : > { %1948 = vadd.xlane.f32.xlu0 %v1947_v29 }
 0xc6f   : > { %v1882_v30 = vpop.f32.mrf.mxu2 }
 0xc70   : > { %2337 = vmatmul.msk.f32.vlgmr.msra.gmra.mxu3 %vm1117_vm1, %v1882_v30 }
 0xcdc   : > { %v1949_v32 = vpop.xlane.xlu0 %1948 }
 0xcdd   : > { %2558 = vrcp.f32 %v1949_v32 }
 0xce3   : > { %v2559_v33 = vpop.eup %2558 }
 0xce4   : > { %v1951_v34 = vmul.f32 %v2559_v33, %v2557_v28 }
 0xce6   : > { %2341 = vmatmul.msk.f32.vlgmr.msrb.gmra.mxu1 %vm1656_vm6, %v1951_v34 }
 0xcf3   : > { %v1905_v36 = vpop.f32.mrf.mxu3 }
 0xcf4   : > { %v1908_v37 = vadd.f32 %v1905_v36, %v1812_v17 }
 0xd63   : > { %v1978_v35 = vpop.f32.mrf.mxu1 }
 0xd64   : > { %2342 = vmatmul.msk.f32.vlgmr.msrb.gmra.mxu2 %vm1117_vm1, %v1978_v35 }
 0xde7   : > { %v2001_v39 = vpop.f32.mrf.mxu2 }
 0xde8   : > { %v2004_v40 = vadd.f32 %v2001_v39, %v1908_v37 }
 0xdea   : > { %v2005_v41 = vsel %vm1039_vm0, %v2004_v40, 0.0 }
 0xdeb   : > { %2006 = vadd.xlane.f32.xlu0 %v2005_v41 }
 0xe5e   : > { %v2007_v42 = vpop.xlane.xlu0 %2006 }
 0xe5f   : > { %v2008_v43 = vmul.f32 %v2007_v42, %v3508_v38 }
 0xe61   : > { %v2009_v44 = vsub.f32 %v2004_v40, %v2008_v43 }
 0xe63   : > { %v2010_v45 = vmul.f32 %v2009_v44, %v2009_v44 }
 0xe65   : > { %v2011_v46 = vsel %vm1039_vm0, %v2010_v45, 0.0 }
 0xe66   : > { %2012 = vadd.xlane.f32.xlu0 %v2011_v46 }
 0xed9   : > { %v2013_v47 = vpop.xlane.xlu0 %2012 }
 0xeda   : > { %v2014_v48 = vmul.f32 %v2013_v47, %v3508_v38 }
 0xedc   : > { %v2015_v49 = vadd.f32 1e-05, %v2014_v48 }
 0xede   : > { %2560 = vrsqrt.f32 %v2015_v49  ;;  %vm2022_vm8 = vweird.f32 %v2015_v49 }
 0xee4   : > { %v2561_v50 = vpop.eup %2560 }
 0xee5   : > { %v2017_v51 = vmul.f32 %v2561_v50, %v2015_v49  ;;  %vm2023_vm7 = vweird.f32 %v2561_v50 }
 0xee6   : > { %vm2024_vm9 = vmor %vm2022_vm8, %vm2023_vm7 }
 0xee7   : > { %v2018_v52 = vmul.f32 %v2561_v50, %v2017_v51 }
 0xee9   : > { %v2019_v53 = vmul.f32 0.5, %v2018_v52 }
 0xeeb   : > { %v2020_v54 = vsub.f32 1.5, %v2019_v53 }
 0xeed   : > { %v2021_v55 = vmul.f32 %v2561_v50, %v2020_v54 }
 0xeef   : > { %v2025_v38 = vsel %vm2024_vm9, %v2561_v50, %v2021_v55 }
 0xef0   : > { %v2026_v57 = vmul.f32 %v2025_v38, %v2009_v44 }
 0xef2   : > { %v2030_v59 = vmul.f32 %v2522_v56, %v2026_v57 }
 0xef4   : > { %v2034_v60 = vadd.f32 %v2523_v58, %v2030_v59 }
 0xef6   : > { %2035 = vst.msk [vmem:[%s1006_s7] sm:$0xff] %vm1039_vm0, %v2034_v60 }
 0xef7   : > { %2949 = shalt.err (!%p2946_p0)
}
 0xef8   : > { %2389 = dma.vmem_to_hbm [thread:$0]  (%p3254_p4), %s2050_s17, 128, %s2052_s1, %s2037_s20  }
 0xef9 PF: > { %s3765_s11 = sld [smem:[#allocation32_spill]]  ;;  %p3767_p2 = scmp.ge.s32.totalorder %s3016_s28, 2 }
 0xefb   : > { %p2430_p12 = pnand %p3767_p2, %p3258_p7 }
 0xefd   : > { %p2431_p1 = pneg %p2430_p12 }
 0xeff   : > { %s2063_s18 = sand.u32 1, %s3765_s11  }
 0xf00   : > { %s2064_s4 = scalar_lea.sflag [#allocation4], %s2063_s18 }
 0xf01   : > { %2999 = dma.done.wait (%p2431_p1), %s2064_s4, 128  }
 0xf02   : > { %3001 = vsyncadd (%p2431_p1), %s2064_s4, 4294967168  ;;  %s3768_s28 = sld [smem:[#allocation34_spill]]  ;;  %s3771_s5 = smov %s3008_s26 }
 0xf03   : > { %s3769_s27 = sld [smem:[#allocation33_spill]] }
 0xf04   : > { %s3770_s25 = sld [smem:[#allocation35_spill]] }
 0xf08   : > { %p47_p5 = scmp.ge.s32.totalorder %s3768_s28, 4  }
 0xf09   : > { %s3772_s26 = smov %s3769_s27 }
 0xf0a   : > { %s3773_s27 = smov %s3770_s25  ;;  %49 = sbr.rel (!%p47_p5) target bundleno = 39 (0x27), region = 230 }
 0xf0f   :  { %2070 = vsyncpa [#allocation3], 1 }
 0xf10   :  { %2072 = vsyncpa [#allocation3 + $0x1], 1 }
 0xf11   :  { %2073 = vsyncpa [#allocation6], 1 }
 0xf12   :  { %2075 = vsyncpa [#allocation6 + $0x1], 1 }
 0xf13   :  { %2076 = vsyncpa [#allocation9], 1 }
 0xf14   :  { %2078 = vsyncpa [#allocation9 + $0x1], 1 }
 0xf15   :  { %2079 = vsyncpa [#allocation12], 1 }
 0xf16   :  { %2080 = vsyncpa [#allocation15], 1 }
 0xf17   :  { %2081 = vsyncpa [#allocation18], 1 }
 0xf18   :  { %2082 = vsyncpa [#allocation21], 1 }
 0xf19   :  { %2083 = vsyncpa [#allocation4], 1 }
 0xf1a   :  { %2085 = vsyncpa [#allocation4 + $0x1], 1 }

</bundles_post_ra>
